<compile_context>
chip_gen: v5e
topology: v5e:2x2
jax: 0.10.0
libtpu: 0.0.40
codegen_flags: <defaults>
</compile_context>

<pallas_src>
import numpy as np
import jax
import jax.numpy as jnp
from jax.experimental import pallas as pl
from jax.experimental.pallas import tpu as pltpu

# ----------------------------- static config --------------------------------
B = 2               # batch
C_IN = 4            # input_channels
L_IN = 128          # input sequence length
NUM_CLASSES = 5
K = 8               # conv kernel size
STRIDE1 = 4         # stride of first conv
PAD = 4             # kernel_size // 2
C1, C2, C3 = 10, 20, 20
FEAT_LEN = 256      # features_len (adaptive pool output length)

L1 = (L_IN + 2 * PAD - K) // STRIDE1 + 1   # conv1 out length  (33)
P1 = L1 // 2 + 1                           # pool1 out length  (17)
L2 = P1 + 2 * PAD - K + 1                  # conv2 out length  (18)
P2 = L2 // 2 + 1                           # pool2 out length  (10)
L3 = P2 + 2 * PAD - K + 1                  # conv3 out length  (11)
P3 = L3 // 2 + 1                           # pool3 out length  (6)

# lane-padded (multiple-of-128) widths for each pooled layer output
N1_PAD = 256        # C1*P1 = 170 -> 256
N2_PAD = 256        # C2*P2 = 200 -> 256
N3_PAD = 128        # C3*P3 = 120 -> 128

FEAT_W = C3 * FEAT_LEN          # 5120 (lane-dense: 40 x 128)
TILE_N = 640                    # feat/head tile width (5 vregs)
OUT_W = FEAT_W + TILE_N         # 5760; last tile carries the fused linear head
N_TILES = OUT_W // TILE_N       # 9
assert FEAT_W % 128 == 0 and TILE_N % 128 == 0 and OUT_W % TILE_N == 0


# ------------------------- host-side constant folding -----------------------
def adaptive_avg_matrix(l_in, l_out):
    """PyTorch AdaptiveAvgPool1d: bin j averages [floor(j*L/O), ceil((j+1)*L/O))."""
    a = np.zeros((l_out, l_in), np.float32)
    for j in range(l_out):
        start = (j * l_in) // l_out
        end = -(-((j + 1) * l_in) // l_out)
        a[j, start:end] = 1.0 / (end - start)
    return a


def conv_relu_pool_matrices(l_in, c_in, c_out, k, stride, pad, w):
    """Fold Conv1d(no bias) + MaxPool1d(2,2,pad=1) into two matrices.

    Input / output are c-major flattened:  idx = channel * length + position.
    Branch a maps to conv position 2i-1, branch b to 2i (the two MaxPool
    candidates).  Out-of-range conv positions (MaxPool -inf padding) give
    all-zero columns, which is exact ONLY because the kernel takes the max
    jointly with 0 (post-ReLU).  w: numpy (c_out, c_in, k).
    """
    l_out = (l_in + 2 * pad - k) // stride + 1
    p_out = l_out // 2 + 1
    mats = []
    for branch in (-1, 0):                          # conv positions 2i-1, 2i
        m = np.zeros((c_in * l_in, c_out * p_out), np.float32)
        for i in range(p_out):
            lo = 2 * i + branch
            if not (0 <= lo < l_out):
                continue                            # MaxPool pad -> zero column
            cols = np.arange(c_out) * p_out + i
            for kk in range(k):
                src = lo * stride + kk - pad
                if not (0 <= src < l_in):
                    continue                        # conv zero-padding
                rows = np.arange(c_in) * l_in + src
                m[np.ix_(rows, cols)] += w[:, :, kk].T   # (c_in, c_out)
        mats.append(m)
    return mats[0], mats[1]


def adaptive_flatten_matrix(l_in, l_out, ch):
    """AdaptiveAvgPool1d(l_out) + torch c-major flatten as one (ch*l_in, ch*l_out) matrix."""
    ad = adaptive_avg_matrix(l_in, l_out)           # (l_out, l_in)
    a = np.zeros((ch * l_in, ch * l_out), np.float32)
    for c in range(ch):
        a[c * l_in:(c + 1) * l_in, c * l_out:(c + 1) * l_out] = ad.T
    return a


def build_cnn1d_operands(params):
    """One-time host-side preparation of all kernel constants (hoisted out of
    the forward path).  Everything fed to the MXU is stored in bfloat16."""
    w1, w2, w3, wl, bl = (np.asarray(p, np.float32) for p in params)

    def layer_matrix(l_in, c_in, c_out, k, stride, pad, w, rows_pad, cols_pad):
        # [Ma_pad | Mb_pad]: both MaxPool branches in one lane-dense matrix,
        # rows padded to the previous layer's lane-padded width.
        ma, mb = conv_relu_pool_matrices(l_in, c_in, c_out, k, stride, pad, w)
        m = np.zeros((rows_pad, 2 * cols_pad), np.float32)
        m[:ma.shape[0], :ma.shape[1]] = ma
        m[:mb.shape[0], cols_pad:cols_pad + mb.shape[1]] = mb
        return m

    m1 = layer_matrix(L_IN, C_IN, C1, K, STRIDE1, PAD, w1, C_IN * L_IN, N1_PAD)  # (512, 512)
    m2 = layer_matrix(P1, C1, C2, K, 1, PAD, w2, N1_PAD, N2_PAD)                 # (256, 512)
    m3 = layer_matrix(P2, C2, C3, K, 1, PAD, w3, N2_PAD, N3_PAD)                 # (256, 256)

    # AdaptiveAvgPool1d(256) + torch c-major flatten, with the Linear head
    # fused as an extra 128-aligned column tile:  [A (5120) | W_head (5) | 0].
    a = adaptive_flatten_matrix(P3, FEAT_LEN, C3)                                # (120, 5120)
    w_head = a @ wl.T                                                            # (120, 5)
    a_fused = np.zeros((N3_PAD, OUT_W), np.float32)
    a_fused[:a.shape[0], :FEAT_W] = a
    a_fused[:w_head.shape[0], FEAT_W:FEAT_W + NUM_CLASSES] = w_head

    consts = tuple(jnp.asarray(c, dtype=jnp.bfloat16) for c in (m1, m2, m3, a_fused))
    return consts + (jnp.asarray(bl, jnp.float32),)


# ------------------------------ Pallas kernel --------------------------------
def cnn1d_kernel(x_ref, m1_ref, m2_ref, m3_ref, a_ref, out_ref, p3_ref):
    @pl.when(pl.program_id(0) == 0)
    def _():
        def conv_relu_pool(x_f32, m_ref, n_pad):
            # One lane-dense matmul covering both MaxPool branches; bf16
            # operands, f32 accumulation.
            h = jnp.dot(x_f32.astype(jnp.bfloat16), m_ref[...],
                        preferred_element_type=jnp.float32)    # (B, 2*n_pad)
            # max(branch_a, branch_b, 0): the joint 0-clamp (ReLU) is what
            # makes the zero-column substitution for the MaxPool -inf padding
            # and conv zero-padding exact.  f32 VPU max (v5e has no bf16 VPU).
            return jnp.maximum(jnp.maximum(h[:, :n_pad], h[:, n_pad:]), 0.0)

        x = x_ref[...]                                    # (B, 512) f32, c-major
        p1 = conv_relu_pool(x, m1_ref, N1_PAD)            # (B, 256)  dropout = identity (eval)
        p2 = conv_relu_pool(p1, m2_ref, N2_PAD)           # (B, 256)
        p3 = conv_relu_pool(p2, m3_ref, N3_PAD)           # (B, 128)
        p3_ref[...] = p3.astype(jnp.bfloat16)             # cast once, at the dot-operand boundary

    # Every grid step: one 640-lane tile of [AdaptiveAvgPool+flatten | head].
    # The a-tiles double-buffer their DMA against the step-0 conv compute.
    out_ref[...] = jnp.dot(p3_ref[...], a_ref[...],
                           preferred_element_type=jnp.float32)


# --------------------------------- wrapper -----------------------------------
@jax.jit
def cnn1d_pallas_forward(x_ncl, operands):
    """x_ncl: (B, C_IN, L_IN) float32 (PyTorch NCL).  Returns (y, x_flat)."""
    m1, m2, m3, a_fused, bl = operands
    batch = x_ncl.shape[0]
    # c-major flatten (c * L_IN + l) matches the composite matrices' row layout.
    x_flat_in = x_ncl.reshape(batch, C_IN * L_IN).astype(jnp.float32)

    out = pl.pallas_call(
        cnn1d_kernel,
        out_shape=jax.ShapeDtypeStruct((batch, OUT_W), jnp.float32),
        grid_spec=pltpu.PrefetchScalarGridSpec(
            num_scalar_prefetch=0,
            grid=(N_TILES,),
            in_specs=[
                pl.BlockSpec((batch, C_IN * L_IN), lambda i: (0, 0)),     # x (resident)
                pl.BlockSpec((C_IN * L_IN, 2 * N1_PAD), lambda i: (0, 0)),  # m1 (resident)
                pl.BlockSpec((N1_PAD, 2 * N2_PAD), lambda i: (0, 0)),     # m2 (resident)
                pl.BlockSpec((N2_PAD, 2 * N3_PAD), lambda i: (0, 0)),     # m3 (resident)
                pl.BlockSpec((N3_PAD, TILE_N), lambda i: (0, i)),         # a_fused (pipelined)
            ],
            out_specs=pl.BlockSpec((batch, TILE_N), lambda i: (0, i)),
            scratch_shapes=[pltpu.VMEM((batch, N3_PAD), jnp.bfloat16)],   # p3 carried across steps
        ),
        compiler_params=pltpu.CompilerParams(dimension_semantics=("arbitrary",)),
    )(x_flat_in, m1, m2, m3, a_fused)

    # feat is already torch's x.reshape(B, -1) layout (c * 256 + l); the head
    # lives in the 128-aligned tail tile -> both slices are cheap XLA slices.
    feat = out[:, :FEAT_W]
    y = out[:, FEAT_W:FEAT_W + NUM_CLASSES] + bl
    return y, feat


# --------------------------- pure-JAX reference ------------------------------
def reference_forward(x_ncl, params):
    w1, w2, w3, wl, bl = params
    dn = ("NCH", "OIH", "NCH")
    hi = jax.lax.Precision.HIGHEST

    def block(x, w, stride):
        y = jax.lax.conv_general_dilated(x, w, (stride,), [(PAD, PAD)],
                                         dimension_numbers=dn, precision=hi)
        y = jnp.maximum(y, 0.0)
        y = jax.lax.reduce_window(y, -jnp.inf, jax.lax.max,
                                  (1, 1, 2), (1, 1, 2),
                                  ((0, 0), (0, 0), (1, 1)))
        return y

    h = block(x_ncl, w1, STRIDE1)      # dropout: identity in eval mode
    h = block(h, w2, 1)
    h = block(h, w3, 1)
    a = jnp.asarray(adaptive_avg_matrix(h.shape[-1], FEAT_LEN))
    h = jnp.einsum("bcl,jl->bcj", h, a, precision=hi)
    x_flat = h.reshape(h.shape[0], -1)
    y = jnp.dot(x_flat, wl.T, precision=hi) + bl
    return y, x_flat


# ------------------------------------ main ------------------------------------
if __name__ == "__main__":
    key = jax.random.PRNGKey(0)
    kx, k1, k2, k3, k4, k5 = jax.random.split(key, 6)

    # Deterministic synthetic parameters (shapes from CNN1d.__init__).
    x = jax.random.normal(kx, (B, C_IN, L_IN), jnp.float32)                      # NCL input
    w1 = jax.random.normal(k1, (C1, C_IN, K), jnp.float32) / np.sqrt(C_IN * K)
    w2 = jax.random.normal(k2, (C2, C1, K), jnp.float32) / np.sqrt(C1 * K)
    w3 = jax.random.normal(k3, (C3, C2, K), jnp.float32) / np.sqrt(C2 * K)
    wl = jax.random.normal(k4, (NUM_CLASSES, C3 * FEAT_LEN), jnp.float32) / np.sqrt(C3 * FEAT_LEN)
    bl = 0.01 * jax.random.normal(k5, (NUM_CLASSES,), jnp.float32)
    params = (w1, w2, w3, wl, bl)

    # One-time constant folding (hoisted out of the forward path).
    operands = build_cnn1d_operands(params)

    y, x_flat = cnn1d_pallas_forward(x, operands)
    jax.block_until_ready((y, x_flat))

    y_ref, xf_ref = reference_forward(x, params)
    assert y.shape == (B, NUM_CLASSES) and x_flat.shape == (B, C3 * FEAT_LEN)
    assert bool(jnp.allclose(x_flat, xf_ref, atol=5e-2, rtol=5e-2)), \
        float(jnp.max(jnp.abs(x_flat - xf_ref)))
    assert bool(jnp.allclose(y, y_ref, atol=5e-2, rtol=5e-2)), \
        float(jnp.max(jnp.abs(y - y_ref)))

    print("KERNEL_OK")
</pallas_src>

<mosaic_0001>
module attributes {stable_mosaic.version = 11 : i64} {
  func.func @cnn1d_kernel(%arg0: i32, %arg1: memref<2x512xf32, #tpu.memory_space<vmem>>, %arg2: memref<512x512xbf16, #tpu.memory_space<vmem>>, %arg3: memref<256x512xbf16, #tpu.memory_space<vmem>>, %arg4: memref<256x256xbf16, #tpu.memory_space<vmem>>, %arg5: memref<128x640xbf16, #tpu.memory_space<vmem>>, %arg6: memref<2x640xf32, #tpu.memory_space<vmem>>, %arg7: memref<2x128xbf16, #tpu.memory_space<vmem>>) attributes {dimension_semantics = [#tpu.dimension_semantics<arbitrary>], iteration_bounds = array<i64: 9>, scalar_prefetch = 0 : i64, scratch_operands = 1 : i64, tpu.core_type = #tpu.core_type<tc>, window_params = [{pipeline_mode = #tpu.pipeline_mode<synchronous>, transform_indices = @transform_0, window_bounds = array<i64: 2, 512>}, {pipeline_mode = #tpu.pipeline_mode<synchronous>, transform_indices = @transform_1, window_bounds = array<i64: 512, 512>}, {pipeline_mode = #tpu.pipeline_mode<synchronous>, transform_indices = @transform_2, window_bounds = array<i64: 256, 512>}, {pipeline_mode = #tpu.pipeline_mode<synchronous>, transform_indices = @transform_3, window_bounds = array<i64: 256, 256>}, {transform_indices = @transform_4, window_bounds = array<i64: 128, 640>}, {transform_indices = @transform_5, window_bounds = array<i64: 2, 640>}]} {
    %c0_i32 = arith.constant 0 : i32
    %0 = arith.cmpi eq, %arg0, %c0_i32 : i32
    %1 = arith.extui %0 : i1 to i32
    %c0_i32_0 = arith.constant 0 : i32
    %2 = arith.cmpi ne, %1, %c0_i32_0 : i32
    scf.if %2 {
      %c0_6 = arith.constant 0 : index
      %c0_7 = arith.constant 0 : index
      %7 = vector.load %arg1[%c0_6, %c0_7] : memref<2x512xf32, #tpu.memory_space<vmem>>, vector<2x512xf32>
      %8 = arith.truncf %7 : vector<2x512xf32> to vector<2x512xbf16>
      %c0_8 = arith.constant 0 : index
      %c0_9 = arith.constant 0 : index
      %9 = vector.load %arg2[%c0_8, %c0_9] : memref<512x512xbf16, #tpu.memory_space<vmem>>, vector<512x512xbf16>
      %cst_10 = arith.constant dense<0.000000e+00> : vector<2x512xf32>
      %10 = tpu.matmul %8, %9, %cst_10 {dimension_numbers = #tpu.dot_dimension_numbers<[1], [0], [0], [1], [0, 0, 1, 1], [], []>} : vector<2x512xbf16>, vector<512x512xbf16>, vector<2x512xf32> -> vector<2x512xf32>
      %11 = vector.extract_strided_slice %10 {offsets = [0, 0], sizes = [2, 256], strides = [1, 1]} : vector<2x512xf32> to vector<2x256xf32>
      %12 = vector.extract_strided_slice %10 {offsets = [0, 256], sizes = [2, 256], strides = [1, 1]} : vector<2x512xf32> to vector<2x256xf32>
      %13 = arith.maximumf %11, %12 : vector<2x256xf32>
      %cst_11 = arith.constant 0.000000e+00 : f32
      %14 = vector.broadcast %cst_11 : f32 to vector<2x256xf32>
      %15 = arith.maximumf %13, %14 : vector<2x256xf32>
      %16 = arith.truncf %15 : vector<2x256xf32> to vector<2x256xbf16>
      %c0_12 = arith.constant 0 : index
      %c0_13 = arith.constant 0 : index
      %17 = vector.load %arg3[%c0_12, %c0_13] : memref<256x512xbf16, #tpu.memory_space<vmem>>, vector<256x512xbf16>
      %cst_14 = arith.constant dense<0.000000e+00> : vector<2x512xf32>
      %18 = tpu.matmul %16, %17, %cst_14 {dimension_numbers = #tpu.dot_dimension_numbers<[1], [0], [0], [1], [0, 0, 1, 1], [], []>} : vector<2x256xbf16>, vector<256x512xbf16>, vector<2x512xf32> -> vector<2x512xf32>
      %19 = vector.extract_strided_slice %18 {offsets = [0, 0], sizes = [2, 256], strides = [1, 1]} : vector<2x512xf32> to vector<2x256xf32>
      %20 = vector.extract_strided_slice %18 {offsets = [0, 256], sizes = [2, 256], strides = [1, 1]} : vector<2x512xf32> to vector<2x256xf32>
      %21 = arith.maximumf %19, %20 : vector<2x256xf32>
      %cst_15 = arith.constant 0.000000e+00 : f32
      %22 = vector.broadcast %cst_15 : f32 to vector<2x256xf32>
      %23 = arith.maximumf %21, %22 : vector<2x256xf32>
      %24 = arith.truncf %23 : vector<2x256xf32> to vector<2x256xbf16>
      %c0_16 = arith.constant 0 : index
      %c0_17 = arith.constant 0 : index
      %25 = vector.load %arg4[%c0_16, %c0_17] : memref<256x256xbf16, #tpu.memory_space<vmem>>, vector<256x256xbf16>
      %cst_18 = arith.constant dense<0.000000e+00> : vector<2x256xf32>
      %26 = tpu.matmul %24, %25, %cst_18 {dimension_numbers = #tpu.dot_dimension_numbers<[1], [0], [0], [1], [0, 0, 1, 1], [], []>} : vector<2x256xbf16>, vector<256x256xbf16>, vector<2x256xf32> -> vector<2x256xf32>
      %27 = vector.extract_strided_slice %26 {offsets = [0, 0], sizes = [2, 128], strides = [1, 1]} : vector<2x256xf32> to vector<2x128xf32>
      %28 = vector.extract_strided_slice %26 {offsets = [0, 128], sizes = [2, 128], strides = [1, 1]} : vector<2x256xf32> to vector<2x128xf32>
      %29 = arith.maximumf %27, %28 : vector<2x128xf32>
      %cst_19 = arith.constant 0.000000e+00 : f32
      %30 = vector.broadcast %cst_19 : f32 to vector<2x128xf32>
      %31 = arith.maximumf %29, %30 : vector<2x128xf32>
      %32 = arith.truncf %31 : vector<2x128xf32> to vector<2x128xbf16>
      %c0_20 = arith.constant 0 : index
      %c0_21 = arith.constant 0 : index
      %33 = vector.load %arg7[%c0_20, %c0_21] : memref<2x128xbf16, #tpu.memory_space<vmem>>, vector<2x128xbf16>
      tpu.vector_store %arg7[%c0_20, %c0_21], %32 {strides = array<i32>} : memref<2x128xbf16, #tpu.memory_space<vmem>>, vector<2x128xbf16>,
    } else {
    }
    %c0 = arith.constant 0 : index
    %c0_1 = arith.constant 0 : index
    %3 = vector.load %arg7[%c0, %c0_1] : memref<2x128xbf16, #tpu.memory_space<vmem>>, vector<2x128xbf16>
    %c0_2 = arith.constant 0 : index
    %c0_3 = arith.constant 0 : index
    %4 = vector.load %arg5[%c0_2, %c0_3] : memref<128x640xbf16, #tpu.memory_space<vmem>>, vector<128x640xbf16>
    %cst = arith.constant dense<0.000000e+00> : vector<2x640xf32>
    %5 = tpu.matmul %3, %4, %cst {dimension_numbers = #tpu.dot_dimension_numbers<[1], [0], [0], [1], [0, 0, 1, 1], [], []>} : vector<2x128xbf16>, vector<128x640xbf16>, vector<2x640xf32> -> vector<2x640xf32>
    %c0_4 = arith.constant 0 : index
    %c0_5 = arith.constant 0 : index
    %6 = vector.load %arg6[%c0_4, %c0_5] : memref<2x640xf32, #tpu.memory_space<vmem>>, vector<2x640xf32>
    tpu.vector_store %arg6[%c0_4, %c0_5], %5 {strides = array<i32>} : memref<2x640xf32, #tpu.memory_space<vmem>>, vector<2x640xf32>,
    return
  }
  func.func @transform_0(%arg0: i32) -> (i32, i32) {
    %c0_i32 = arith.constant 0 : i32
    %c0_i32_0 = arith.constant 0 : i32
    %c0_i32_1 = arith.constant 0 : i32
    return %c0_i32, %c0_i32_0 : i32, i32
  }
  func.func @transform_1(%arg0: i32) -> (i32, i32) {
    %c0_i32 = arith.constant 0 : i32
    %c0_i32_0 = arith.constant 0 : i32
    %c0_i32_1 = arith.constant 0 : i32
    return %c0_i32, %c0_i32_0 : i32, i32
  }
  func.func @transform_2(%arg0: i32) -> (i32, i32) {
    %c0_i32 = arith.constant 0 : i32
    %c0_i32_0 = arith.constant 0 : i32
    %c0_i32_1 = arith.constant 0 : i32
    return %c0_i32, %c0_i32_0 : i32, i32
  }
  func.func @transform_3(%arg0: i32) -> (i32, i32) {
    %c0_i32 = arith.constant 0 : i32
    %c0_i32_0 = arith.constant 0 : i32
    %c0_i32_1 = arith.constant 0 : i32
    return %c0_i32, %c0_i32_0 : i32, i32
  }
  func.func @transform_4(%arg0: i32) -> (i32, i32) {
    %c0_i32 = arith.constant 0 : i32
    %c0_i32_0 = arith.constant 0 : i32
    return %c0_i32, %arg0 : i32, i32
  }
  func.func @transform_5(%arg0: i32) -> (i32, i32) {
    %c0_i32 = arith.constant 0 : i32
    %c0_i32_0 = arith.constant 0 : i32
    return %c0_i32, %arg0 : i32, i32
  }
}

</mosaic_0001>

<bundles_post_ra>
// kernel: cnn1d_pallas_forward.1
= control target key start
LH: loop header
LB: loop body
LE: loop exit
PB: predicated region body
PF: predicated region fallthrough
CT: control target
= control target key end

     0   :  { %10 = vsyncpa [#allocation4], 0  ;;  %s4366_s0 = inlined_call_operand.vmem [shape: f32[2,512], index: 0, kind: input, shape index: {}]   ;;  %s4367_s1 = inlined_call_operand.hbm [shape: bf16[512,512], index: 1, kind: input, shape index: {}]   ;;  %s4368_s2 = inlined_call_operand.hbm [shape: bf16[256,512], index: 2, kind: input, shape index: {}]   ;;  %s4369_s3 = inlined_call_operand.hbm [shape: bf16[256,256], index: 3, kind: input, shape index: {}]   ;;  %s4370_s4 = inlined_call_operand.hbm [shape: bf16[128,5760], index: 4, kind: input, shape index: {}]   ;;  %s4371_s5 = inlined_call_operand.vmem [shape: f32[2,5760], index: 5, kind: output, shape index: {}]  }
   0x1   :  { %11 = vsyncpa [#allocation6], 0 }
   0x2   :  { %12 = vsyncpa [#allocation9], 0 }
   0x3   :  { %14 = vsyncpa [#allocation9 + $0x1], 0  ;;  %s4098_s18 = smov 0   ;;  %s4100_s19 = smov 0  }
   0x4   :  { %s4102_s20 = smov 0   ;;  %s4104_s21 = smov 0  }
   0x5 LB: > { %s4117_s22 = sadd.s32 4294967295, %s4056_s21   ;;  %p124_p0 = scmp.ne.s32.totalorder %s4048_s19, %s4044_s18  ;;  %s4056_s21 = sphi %s4104_s21, %s4379_s21   ;;  %s4052_s20 = sphi %s4102_s20, %s4378_s20   ;;  %s4048_s19 = sphi %s4100_s19, %s4377_s19   ;;  %s4044_s18 = sphi %s4098_s18, %s4376_s18  }
   0x6   : > { %p125_p1 = scmp.eq.s32.totalorder %s4117_s22, 0  ;;  %p2480_p2 = scmp.ge.s32.totalorder %s4056_s21, 1 }
   0x7   : > { %p161_p3 = scmp.lt.s32.totalorder %s4056_s21, 10  ;;  %p2481_p4 = scmp.ne.s32.totalorder %s4117_s22, 0 }
   0x8   : > { %p4126_p5 = por %p125_p1, %p124_p0  ;;  %s189_s27 = sshll.u32 %s4368_s2, 4  ;;  %s190_s27 = int_to_ptr.hbm [resolvable:$true] %s189_s27 }
   0x9   : > { %p4130_p6 = pnand %p2480_p2, %p161_p3  ;;  %s4058_s28 = smov [#allocation5]  }
   0xa   : > { %s191_s29 = sshll.u32 %s4058_s28, 4  ;;  %s175_s8 = sshll.u32 %s4367_s1, 4  ;;  %s192_s29 = int_to_ptr.vmem [resolvable:$true] %s191_s29  ;;  %s176_s8 = int_to_ptr.hbm [resolvable:$true] %s175_s8 }
   0xb   : > { %p3831_p7 = pneg %p4130_p6  ;;  %s4059_s9 = smov 256  }
   0xc   : > { %s4060_s10 = smov 16   ;;  %s4061_s11 = smov [#allocation3]  }
   0xd   : > { %p4141_p8 = pnand %p3831_p7, %p125_p1  ;;  %s177_s12 = sshll.u32 %s4061_s11, 4  ;;  %s178_s12 = int_to_ptr.vmem [resolvable:$true] %s177_s12 }
   0xe   : > { %s203_s15 = sshll.u32 %s4369_s3, 4  ;;  %s4062_s16 = smov [#allocation7]   ;;  %s204_s15 = int_to_ptr.hbm [resolvable:$true] %s203_s15 }
   0xf   : > { %3837 = dma.hbm_to_vmem [thread:$0]  (!%p4141_p8), %s190_s27, 8192, %s192_s29, [#allocation6], %s4059_s9, %s4059_s9, %s4060_s10  }
  0x10   : > { %3834 = dma.hbm_to_vmem [thread:$0]  (!%p4141_p8), %s176_s8, 16384, %s178_s12, [#allocation4], %s4059_s9, %s4059_s9, %s4060_s10  }
  0x11   : > { %s205_s17 = sshll.u32 %s4062_s16, 4  ;;  %s4063_s18 = smov 128   ;;  %s206_s17 = int_to_ptr.vmem [resolvable:$true] %s205_s17 }
  0x12   : > { %s4064_s25 = smov 8   ;;  %s4158_s26 = sadd.s32 1, %s4056_s21  }
  0x13   : > { %3840 = dma.hbm_to_vmem [thread:$0]  (!%p4141_p8), %s204_s15, 4096, %s206_s17, [#allocation6], %s4063_s18, %s4063_s18, %s4064_s25  }
  0x14   : > { %s108_s27 = ssub.s32 %s4056_s21, %s4158_s26  ;;  %s111_s28 = sadd.s32 1, %s4052_s20 }
  0x15   : > { %p109_p9 = scmp.eq.s32.totalorder %s108_s27, 0  ;;  %p118_p10 = scmp.ne.s32.totalorder %s4052_s20, %s4048_s19 }
  0x16   : > { %p119_p11 = scmp.eq.s32.totalorder %s4056_s21, 0  ;;  %p3848_p12 = scmp.lt.s32.totalorder %s4056_s21, 9 }
  0x17   : > { %s4168_s29 = scalar_select %p109_p9, %s4052_s20, %s111_s28  }
  0x18   : > { %p120_p13 = por %p119_p11, %p118_p10  ;;  %s219_s6 = sand.u32 1, %s4052_s20  }
  0x19   : > { %s3815_s7 = smul.u32 320, %s219_s6  ;;  %s220_s15 = scalar_lea.sflag [#allocation9], %s219_s6 }
  0x1a   : > { %s3550_s8 = smul.u32 20, %s4056_s21  ;;  %p4172_p0 = pnand %p3848_p12, %p120_p13 }
  0x1b   : > { %s223_s12 = scalar_lea.vmem [#allocation8], %s3815_s7  ;;  %s3991_s25 = scalar_lea.hbm %s4370_s4, 2880 }
  0x1c   : > { %s228_s11 = scalar_lea.hbm %s4370_s4, %s3550_s8  ;;  %s231_s13 = sshll.u32 %s223_s12, 4  ;;  %s232_s13 = int_to_ptr.vmem [resolvable:$true] %s231_s13 }
  0x1d   : > { %s229_s14 = sshll.u32 %s228_s11, 4  ;;  %p3988_p3 = pneg %p4172_p0  ;;  %s230_s14 = int_to_ptr.hbm [resolvable:$true] %s229_s14 }
  0x1e   : > { %s3984_s16 = sshra.s32 %s230_s14, 4  ;;  %s3985_s16 = int_to_ptr.hbm [resolvable:$true] %s3984_s16 }
  0x1f   : > { %s3986_s17 = scalar_lea.hbm %s3985_s16, 320  ;;  %p3992_p9 = scmp.lt.s32.totalorder %s3985_s16, %s4370_s4 }
  0x20   : > { %p3987_p2 = scmp.ne.s32.totalorder %s3985_s16, %s3986_s17  ;;  %p3993_p10 = scmp.lt.s32.totalorder %s3991_s25, %s3986_s17 }
  0x22   : > { %p3989_p7 = pnand %p3988_p3, %p3987_p2  ;;  %p3994_p11 = por %p3993_p10, %p3992_p9 }
  0x24   : > { %p3990_p8 = pneg %p3989_p7 }
  0x26   : > { %p3995_p12 = pnand %p3994_p11, %p3990_p8 }
  0x28   : > { %3998 = shalt.err (!%p3995_p12)
}
  0x29   : > { %s4065_s6 = smov 2880   ;;  %s4066_s7 = smov 320  }
  0x2a   : > { %s4067_s8 = smov 20   ;;  %243 = sbr.rel (%p4130_p6) target bundleno = 833 (0x341), region = 40 }
  0x2b   : > { %3844 = dma.hbm_to_vmem [thread:$0]  (!%p4172_p0), %s230_s14, 5120, %s232_s13, %s220_s15, %s4065_s6, %s4066_s7, %s4067_s8  }
  0x2f   : > { %4031 = dma.done.wait (%p125_p1), [#allocation4], 16384  }
  0x30   : > { %4033 = vsyncadd (%p125_p1), [#allocation4], 4294950912 }
  0x31   : > { %4035 = dma.done.wait (%p125_p1), [#allocation6], 12288  }
  0x32   : > { %4037 = vsyncadd (%p125_p1), [#allocation6], 4294955008  ;;  %s260_s30 = sand.u32 1, %s4048_s19  }
  0x33   : > { %s3816_s9 = smul.u32 320, %s260_s30  ;;  %s261_s10 = scalar_lea.sflag [#allocation9], %s260_s30 }
  0x35   : > { %s4200_s11 = scalar_lea.vmem [#allocation8], %s3816_s9 }
  0x36   : > { %4039 = dma.done.wait (%p4126_p5), %s261_s10, 5120  }
  0x37   : > { %4041 = vsyncadd (%p4126_p5), %s261_s10, 4294962176  ;;  %s293_s24 = smul.u32 5, %s4117_s22 }
  0x39   : > { %p294_p6 = scmp.lt.s32.totalorder %s293_s24, 44  ;;  %302 = sbr.rel (%p2481_p4) target bundleno = 633 (0x279), region = 60 }
  0x3b   : > { %s4381_s24 = smov (!%p294_p6, %s293_s24), 44 }
  0x3c   : > { %s2490_s12 = sshll.u32 %s4381_s24, 1 }
  0x3d   : > { %s4210_s15 = scalar_lea.vmem %s4371_s5, %s2490_s12 }
  0x3e   : > { %v2606_v0 = vld [vmem:[#allocation3 + $0xe0] sm:$0xf]  ;;  %v3581_v1 = vld [vmem:[#allocation3 + $0xec] sm:$0xf0] }
  0x3f   : > { %v2734_v2 = vld [vmem:[#allocation3 + $0x1e0] sm:$0xf]  ;;  %v2607_v3 = vor.u32 %v3581_v1, %v2606_v0  ;;  %v3613_v4 = vld [vmem:[#allocation3 + $0x1ec] sm:$0xf0] }
  0x40   : > { %v2862_v5 = vld [vmem:[#allocation3 + $0x2e0] sm:$0xf]  ;;  %v3645_v6 = vld [vmem:[#allocation3 + $0x2ec] sm:$0xf0]  ;;  %v2735_v7 = vor.u32 %v3613_v4, %v2734_v2 }
  0x41   : > { %v2863_v8 = vor.u32 %v3645_v6, %v2862_v5  ;;  %v2990_v9 = vld [vmem:[#allocation3 + $0x3e0] sm:$0xf]  ;;  %v3677_v10 = vld [vmem:[#allocation3 + $0x3ec] sm:$0xf0]  ;;  %1086 = vmatpush.bf16.msra.mxu0 %v2607_v3 }
  0x42   : > { %v2590_v11 = vld [vmem:[#allocation3 + $0xc0] sm:$0xf]  ;;  %v2991_v12 = vor.u32 %v3677_v10, %v2990_v9  ;;  %v3577_v13 = vld [vmem:[#allocation3 + $0xcc] sm:$0xf0]  ;;  %1099 = vmatpush.bf16.msra.mxu1 %v2735_v7 }
  0x43   : > { %v2718_v14 = vld [vmem:[#allocation3 + $0x1c0] sm:$0xf]  ;;  %v3609_v15 = vld [vmem:[#allocation3 + $0x1cc] sm:$0xf0]  ;;  %1112 = vmatpush.bf16.msra.mxu2 %v2863_v8  ;;  %v2591_v16 = vor.u32 %v3577_v13, %v2590_v11 }
  0x44   : > { %v2719_v17 = vor.u32 %v3609_v15, %v2718_v14  ;;  %v2846_v18 = vld [vmem:[#allocation3 + $0x2c0] sm:$0xf]  ;;  %v3641_v19 = vld [vmem:[#allocation3 + $0x2cc] sm:$0xf0]  ;;  %1125 = vmatpush.bf16.msra.mxu3 %v2991_v12 }
  0x45   : > { %v2974_v20 = vld [vmem:[#allocation3 + $0x3c0] sm:$0xf]  ;;  %v2847_v21 = vor.u32 %v3641_v19, %v2846_v18  ;;  %v3673_v22 = vld [vmem:[#allocation3 + $0x3cc] sm:$0xf0]  ;;  %1087 = vmatpush.bf16.msra.mxu0 %v2591_v16 }
  0x46   : > { %v2574_v23 = vld [vmem:[#allocation3 + $0xa0] sm:$0xf]  ;;  %v3573_v24 = vld [vmem:[#allocation3 + $0xac] sm:$0xf0]  ;;  %v2975_v25 = vor.u32 %v3673_v22, %v2974_v20  ;;  %1100 = vmatpush.bf16.msra.mxu1 %v2719_v17 }
  0x47   : > { %v2702_v26 = vld [vmem:[#allocation3 + $0x1a0] sm:$0xf]  ;;  %v3605_v27 = vld [vmem:[#allocation3 + $0x1ac] sm:$0xf0]  ;;  %v2575_v29 = vor.u32 %v3573_v24, %v2574_v23  ;;  %1113 = vmatpush.bf16.msra.mxu2 %v2847_v21 }
  0x48   : > { %v2830_v28 = vld [vmem:[#allocation3 + $0x2a0] sm:$0xf]  ;;  %v3637_v30 = vld [vmem:[#allocation3 + $0x2ac] sm:$0xf0]  ;;  %v2703_v33 = vor.u32 %v3605_v27, %v2702_v26  ;;  %1126 = vmatpush.bf16.msra.mxu3 %v2975_v25 }
  0x49   : > { %v2958_v31 = vld [vmem:[#allocation3 + $0x3a0] sm:$0xf]  ;;  %v3669_v32 = vld [vmem:[#allocation3 + $0x3ac] sm:$0xf0]  ;;  %v2831_v34 = vor.u32 %v3637_v30, %v2830_v28  ;;  %1088 = vmatpush.bf16.msra.mxu0 %v2575_v29  ;;  %v3579_v28 = vld [vmem:[#allocation3 + $0xe4] sm:$0xf] }
  0x4a   : > { %v2558_v35 = vld [vmem:[#allocation3 + $0x80] sm:$0xf]  ;;  %v3569_v36 = vld [vmem:[#allocation3 + $0x8c] sm:$0xf0]  ;;  %v2959_v38 = vor.u32 %v3669_v32, %v2958_v31  ;;  %1101 = vmatpush.bf16.msra.mxu1 %v2703_v33  ;;  %v2608_v29 = vld [vmem:[#allocation3 + $0xf0] sm:$0xf0] }
  0x4b   : > { %v2686_v37 = vld [vmem:[#allocation3 + $0x180] sm:$0xf]  ;;  %v3601_v39 = vld [vmem:[#allocation3 + $0x18c] sm:$0xf0]  ;;  %v2559_v44 = vor.u32 %v3569_v36, %v2558_v35  ;;  %1114 = vmatpush.bf16.msra.mxu2 %v2831_v34  ;;  %v3611_v30 = vld [vmem:[#allocation3 + $0x1e4] sm:$0xf] }
  0x4c   : > { %v2814_v40 = vld [vmem:[#allocation3 + $0x280] sm:$0xf]  ;;  %v3633_v41 = vld [vmem:[#allocation3 + $0x28c] sm:$0xf0]  ;;  %v2687_v45 = vor.u32 %v3601_v39, %v2686_v37  ;;  %1127 = vmatpush.bf16.msra.mxu3 %v2959_v38  ;;  %v2736_v32 = vld [vmem:[#allocation3 + $0x1f0] sm:$0xf0] }
  0x4d   : > { %v2942_v42 = vld [vmem:[#allocation3 + $0x380] sm:$0xf]  ;;  %v3665_v43 = vld [vmem:[#allocation3 + $0x38c] sm:$0xf0]  ;;  %v2815_v46 = vor.u32 %v3633_v41, %v2814_v40  ;;  %1089 = vmatpush.bf16.msra.mxu0 %v2559_v44  ;;  %v3643_v33 = vld [vmem:[#allocation3 + $0x2e4] sm:$0xf]  ;;  %v2611_v40 = vor.u32 %v3579_v28, %v2608_v29  ;;  %v2739_v41 = vor.u32 %v3611_v30, %v2736_v32 }
  0x4e   : > { %v2542_v47 = vld [vmem:[#allocation3 + $0x60] sm:$0xf]  ;;  %v3565_v48 = vld [vmem:[#allocation3 + $0x6c] sm:$0xf0]  ;;  %v2943_v50 = vor.u32 %v3665_v43, %v2942_v42  ;;  %1102 = vmatpush.bf16.msra.mxu1 %v2687_v45  ;;  %v2864_v34 = vld [vmem:[#allocation3 + $0x2f0] sm:$0xf0] }
  0x4f   : > { %v2670_v49 = vld [vmem:[#allocation3 + $0x160] sm:$0xf]  ;;  %v3597_v51 = vld [vmem:[#allocation3 + $0x16c] sm:$0xf0]  ;;  %v2543_v56 = vor.u32 %v3565_v48, %v2542_v47  ;;  %1115 = vmatpush.bf16.msra.mxu2 %v2815_v46  ;;  %v3675_v37 = vld [vmem:[#allocation3 + $0x3e4] sm:$0xf]  ;;  %v2867_v42 = vor.u32 %v3643_v33, %v2864_v34 }
  0x50   : > { %v2798_v52 = vld [vmem:[#allocation3 + $0x260] sm:$0xf]  ;;  %v3629_v53 = vld [vmem:[#allocation3 + $0x26c] sm:$0xf0]  ;;  %v2671_v57 = vor.u32 %v3597_v51, %v2670_v49  ;;  %1128 = vmatpush.bf16.msra.mxu3 %v2943_v50  ;;  %v2992_v38 = vld [vmem:[#allocation3 + $0x3f0] sm:$0xf0] }
  0x51   : > { %v2926_v54 = vld [vmem:[#allocation3 + $0x360] sm:$0xf]  ;;  %v3661_v55 = vld [vmem:[#allocation3 + $0x36c] sm:$0xf0]  ;;  %v2799_v58 = vor.u32 %v3629_v53, %v2798_v52  ;;  %1090 = vmatpush.bf16.msra.mxu0 %v2543_v56  ;;  %v3575_v43 = vld [vmem:[#allocation3 + $0xc4] sm:$0xf]  ;;  %v2995_v46 = vor.u32 %v3675_v37, %v2992_v38 }
  0x52   : > { %v2526_v59 = vld [vmem:[#allocation3 + $0x40] sm:$0xf]  ;;  %v3561_v60 = vld [vmem:[#allocation3 + $0x4c] sm:$0xf0]  ;;  %v2927_v62 = vor.u32 %v3661_v55, %v2926_v54  ;;  %1103 = vmatpush.bf16.msra.mxu1 %v2671_v57  ;;  %v2592_v44 = vld [vmem:[#allocation3 + $0xd0] sm:$0xf0] }
  0x53   : > { %v2654_v61 = vld [vmem:[#allocation3 + $0x140] sm:$0xf]  ;;  %v3593_v63 = vld [vmem:[#allocation3 + $0x14c] sm:$0xf0]  ;;  %v2527_v4 = vor.u32 %v3561_v60, %v2526_v59  ;;  %1116 = vmatpush.bf16.msra.mxu2 %v2799_v58  ;;  %v3607_v45 = vld [vmem:[#allocation3 + $0x1c4] sm:$0xf]  ;;  %v2595_v52 = vor.u32 %v3575_v43, %v2592_v44 }
  0x54   : > { %v2782_v0 = vld [vmem:[#allocation3 + $0x240] sm:$0xf]  ;;  %v3625_v1 = vld [vmem:[#allocation3 + $0x24c] sm:$0xf0]  ;;  %v2655_v5 = vor.u32 %v3593_v63, %v2654_v61  ;;  %1129 = vmatpush.bf16.msra.mxu3 %v2927_v62  ;;  %v2720_v47 = vld [vmem:[#allocation3 + $0x1d0] sm:$0xf0] }
  0x55   : > { %v2910_v2 = vld [vmem:[#allocation3 + $0x340] sm:$0xf]  ;;  %v3657_v3 = vld [vmem:[#allocation3 + $0x34c] sm:$0xf0]  ;;  %v2783_v6 = vor.u32 %v3625_v1, %v2782_v0  ;;  %1091 = vmatpush.bf16.msra.mxu0 %v2527_v4  ;;  %v3639_v48 = vld [vmem:[#allocation3 + $0x2c4] sm:$0xf]  ;;  %v2723_v53 = vor.u32 %v3607_v45, %v2720_v47 }
  0x56   : > { %v2510_v7 = vld [vmem:[#allocation3 + $0x20] sm:$0xf]  ;;  %v3557_v8 = vld [vmem:[#allocation3 + $0x2c] sm:$0xf0]  ;;  %v2911_v10 = vor.u32 %v3657_v3, %v2910_v2  ;;  %1104 = vmatpush.bf16.msra.mxu1 %v2655_v5  ;;  %v2848_v49 = vld [vmem:[#allocation3 + $0x2d0] sm:$0xf0] }
  0x57   : > { %v2638_v9 = vld [vmem:[#allocation3 + $0x120] sm:$0xf]  ;;  %v3589_v11 = vld [vmem:[#allocation3 + $0x12c] sm:$0xf0]  ;;  %v2511_v16 = vor.u32 %v3557_v8, %v2510_v7  ;;  %1117 = vmatpush.bf16.msra.mxu2 %v2783_v6  ;;  %v3671_v50 = vld [vmem:[#allocation3 + $0x3c4] sm:$0xf]  ;;  %v2851_v54 = vor.u32 %v3639_v48, %v2848_v49 }
  0x58   : > { %v2766_v12 = vld [vmem:[#allocation3 + $0x220] sm:$0xf]  ;;  %v3621_v13 = vld [vmem:[#allocation3 + $0x22c] sm:$0xf0]  ;;  %v2639_v19 = vor.u32 %v3589_v11, %v2638_v9  ;;  %1130 = vmatpush.bf16.msra.mxu3 %v2911_v10  ;;  %v2976_v51 = vld [vmem:[#allocation3 + $0x3d0] sm:$0xf0] }
  0x59   : > { %v2894_v14 = vld [vmem:[#allocation3 + $0x320] sm:$0xf]  ;;  %v3653_v15 = vld [vmem:[#allocation3 + $0x32c] sm:$0xf0]  ;;  %v2767_v20 = vor.u32 %v3621_v13, %v2766_v12  ;;  %1092 = vmatpush.bf16.msra.mxu0 %v2511_v16  ;;  %v3571_v55 = vld [vmem:[#allocation3 + $0xa4] sm:$0xf]  ;;  %v2979_v58 = vor.u32 %v3671_v50, %v2976_v51 }
  0x5a   : > { %v2494_v17 = vld [vmem:[#allocation3] sm:$0xf]  ;;  %v3553_v18 = vld [vmem:[#allocation3 + $0xc] sm:$0xf0]  ;;  %v2895_v24 = vor.u32 %v3653_v15, %v2894_v14  ;;  %1105 = vmatpush.bf16.msra.mxu1 %v2639_v19  ;;  %v2576_v56 = vld [vmem:[#allocation3 + $0xb0] sm:$0xf0] }
  0x5b   : > { %v2622_v21 = vld [vmem:[#allocation3 + $0x100] sm:$0xf]  ;;  %v3585_v22 = vld [vmem:[#allocation3 + $0x10c] sm:$0xf0]  ;;  %v2495_v31 = vor.u32 %v3553_v18, %v2494_v17  ;;  %1118 = vmatpush.bf16.msra.mxu2 %v2767_v20  ;;  %v3603_v57 = vld [vmem:[#allocation3 + $0x1a4] sm:$0xf]  ;;  %v2579_v0 = vor.u32 %v3571_v55, %v2576_v56 }
  0x5c   : > { %v2750_v23 = vld [vmem:[#allocation3 + $0x200] sm:$0xf]  ;;  %v3617_v25 = vld [vmem:[#allocation3 + $0x20c] sm:$0xf0]  ;;  %v2623_v35 = vor.u32 %v3585_v22, %v2622_v21  ;;  %1131 = vmatpush.bf16.msra.mxu3 %v2895_v24  ;;  %v2704_v59 = vld [vmem:[#allocation3 + $0x1b0] sm:$0xf0] }
  0x5d   : > { %v2878_v26 = vld [vmem:[#allocation3 + $0x300] sm:$0xf]  ;;  %v3649_v27 = vld [vmem:[#allocation3 + $0x30c] sm:$0xf0]  ;;  %v2751_v36 = vor.u32 %v3617_v25, %v2750_v23  ;;  %1093 = vmatpush.bf16.msra.mxu0 %v2495_v31  ;;  %v3635_v60 = vld [vmem:[#allocation3 + $0x2a4] sm:$0xf]  ;;  %v2707_v3 = vor.u32 %v3603_v57, %v2704_v59 }
  0x5e   : > { %v2879_v39 = vor.u32 %v3649_v27, %v2878_v26  ;;  %1106 = vmatpush.bf16.msra.mxu1 %v2623_v35  ;;  %v2832_v61 = vld [vmem:[#allocation3 + $0x2b0] sm:$0xf0]  ;;  %v3667_v62 = vld [vmem:[#allocation3 + $0x3a4] sm:$0xf] }
  0x5f   : > { %1119 = vmatpush.bf16.msra.mxu2 %v2751_v36  ;;  %v2960_v63 = vld [vmem:[#allocation3 + $0x3b0] sm:$0xf0]  ;;  %v3567_v1 = vld [vmem:[#allocation3 + $0x84] sm:$0xf]  ;;  %v2835_v4 = vor.u32 %v3635_v60, %v2832_v61 }
  0x60   : > { %1132 = vmatpush.bf16.msra.mxu3 %v2879_v39  ;;  %v303_v2 = vld [vmem:[%s4366_s0] sm:$0xff]  ;;  %v3599_v6 = vld [vmem:[#allocation3 + $0x184] sm:$0xf]  ;;  %v2963_v7 = vor.u32 %v3667_v62, %v2960_v63 }
  0x61   : > { %1138 = vmatpush.bf16.msrb.mxu0 %v2611_v40  ;;  %v2560_v5 = vld [vmem:[#allocation3 + $0x90] sm:$0xf0]  ;;  %305 = vst [vmem:[#allocation1] ss:$4 sm:$0xff] %v303_v2  ;;  %v3631_v9 = vld [vmem:[#allocation3 + $0x284] sm:$0xf] }
  0x62   : > { %1151 = vmatpush.bf16.msrb.mxu1 %v2739_v41  ;;  %v2688_v8 = vld [vmem:[#allocation3 + $0x190] sm:$0xf0]  ;;  %v3663_v11 = vld [vmem:[#allocation3 + $0x384] sm:$0xf]  ;;  %v2563_v13 = vor.u32 %v3567_v1, %v2560_v5  ;;  %v2614_v5 = vld [vmem:[#allocation3 + $0xe8] sm:$0xf] }
  0x63   : > { %1164 = vmatpush.bf16.msrb.mxu2 %v2867_v42  ;;  %v2816_v10 = vld [vmem:[#allocation3 + $0x290] sm:$0xf0]  ;;  %v3563_v14 = vld [vmem:[#allocation3 + $0x64] sm:$0xf]  ;;  %v2691_v15 = vor.u32 %v3599_v6, %v2688_v8  ;;  %v3582_v6 = vld [vmem:[#allocation3 + $0xf4] sm:$0xf0] }
  0x64   : > { %1177 = vmatpush.bf16.msrb.mxu3 %v2995_v46  ;;  %v2944_v12 = vld [vmem:[#allocation3 + $0x390] sm:$0xf0]  ;;  %v2819_v16 = vor.u32 %v3631_v9, %v2816_v10  ;;  %v3595_v18 = vld [vmem:[#allocation3 + $0x164] sm:$0xf]  ;;  %v3614_v9 = vld [vmem:[#allocation3 + $0x1f4] sm:$0xf0] }
  0x65   : > { %1139 = vmatpush.bf16.msrb.mxu0 %v2595_v52  ;;  %v2544_v17 = vld [vmem:[#allocation3 + $0x70] sm:$0xf0]  ;;  %v2947_v20 = vor.u32 %v3663_v11, %v2944_v12  ;;  %v3627_v21 = vld [vmem:[#allocation3 + $0x264] sm:$0xf]  ;;  %v2870_v10 = vld [vmem:[#allocation3 + $0x2e8] sm:$0xf] }
  0x66   : > { %1152 = vmatpush.bf16.msrb.mxu1 %v2723_v53  ;;  %v2672_v19 = vld [vmem:[#allocation3 + $0x170] sm:$0xf0]  ;;  %v3659_v23 = vld [vmem:[#allocation3 + $0x364] sm:$0xf]  ;;  %v2547_v27 = vor.u32 %v3563_v14, %v2544_v17  ;;  %v3646_v11 = vld [vmem:[#allocation3 + $0x2f4] sm:$0xf0]  ;;  %v2615_v17 = vor.u32 %v3582_v6, %v2614_v5 }
  0x67   : > { %1165 = vmatpush.bf16.msrb.mxu2 %v2851_v54  ;;  %v2800_v22 = vld [vmem:[#allocation3 + $0x270] sm:$0xf0]  ;;  %v3559_v25 = vld [vmem:[#allocation3 + $0x44] sm:$0xf]  ;;  %v2675_v28 = vor.u32 %v3595_v18, %v2672_v19  ;;  %v2998_v14 = vld [vmem:[#allocation3 + $0x3e8] sm:$0xf]  ;;  %v2871_v19 = vor.u32 %v3646_v11, %v2870_v10 }
  0x68   : > { %1178 = vmatpush.bf16.msrb.mxu3 %v2979_v58  ;;  %v2928_v24 = vld [vmem:[#allocation3 + $0x370] sm:$0xf0]  ;;  %v3591_v29 = vld [vmem:[#allocation3 + $0x144] sm:$0xf]  ;;  %v2803_v32 = vor.u32 %v3627_v21, %v2800_v22  ;;  %v3578_v21 = vld [vmem:[#allocation3 + $0xd4] sm:$0xf0] }
  0x69   : > { %1140 = vmatpush.bf16.msrb.mxu0 %v2579_v0  ;;  %v2528_v26 = vld [vmem:[#allocation3 + $0x50] sm:$0xf0]  ;;  %v308_v30 = vld.sshfl [vmem:[#allocation1 + $0x10] sm:$0xff pattern:$0x73625140]  ;;  %v2931_v37 = vor.u32 %v3659_v23, %v2928_v24 }
  0x6a   : > { %1153 = vmatpush.bf16.msrb.mxu1 %v2707_v3  ;;  %v309_v31 = vld.sshfl [vmem:[#allocation1 + $0x18] sm:$0xff pattern:$0x73625140]  ;;  %v4217_v33 = vpack.c.bf16 %v308_v30, %v308_v30  ;;  %v306_v35 = vld.sshfl [vmem:[#allocation1] sm:$0xff pattern:$0x73625140]  ;;  %v2531_v45 = vor.u32 %v3559_v25, %v2528_v26 }
  0x6b   : > { %1166 = vmatpush.bf16.msrb.mxu2 %v2835_v4  ;;  %v4219_v34 = vpack.c.bf16 %v309_v31, %v309_v31  ;;  %v307_v36 = vld.sshfl [vmem:[#allocation1 + $0x8] sm:$0xff pattern:$0x73625140]  ;;  %v2656_v38 = vld [vmem:[#allocation3 + $0x150] sm:$0xf0]  ;;  %v4221_v41 = vpack.c.bf16 %v306_v35, %v306_v35 }
  0x6c   : > { %1179 = vmatpush.bf16.msrb.mxu3 %v2963_v7  ;;  %v3623_v39 = vld [vmem:[#allocation3 + $0x244] sm:$0xf]  ;;  %v2784_v40 = vld [vmem:[#allocation3 + $0x250] sm:$0xf0]  ;;  %v4223_v42 = vpack.c.bf16 %v307_v36, %v307_v36  ;;  %1120 = vmatmul.bf16.vlgmr.msra.gmra.mxu2 %v4217_v33  ;;  %v2659_v46 = vor.u32 %v3591_v29, %v2656_v38  ;;  %v2742_v7 = vld [vmem:[#allocation3 + $0x1e8] sm:$0xf] }
  0x6d   : > { %1141 = vmatpush.bf16.msrb.mxu0 %v2563_v13  ;;  %v3655_v43 = vld [vmem:[#allocation3 + $0x344] sm:$0xf]  ;;  %v2912_v44 = vld [vmem:[#allocation3 + $0x350] sm:$0xf0]  ;;  %1133 = vmatmul.bf16.vlgmr.msra.gmra.mxu3 %v4219_v34  ;;  %v2787_v47 = vor.u32 %v3623_v39, %v2784_v40  ;;  %v2743_v18 = vor.u32 %v3614_v9, %v2742_v7  ;;  %v2726_v22 = vld [vmem:[#allocation3 + $0x1c8] sm:$0xf] }
  0x6e   : > { %1154 = vmatpush.bf16.msrb.mxu1 %v2691_v15  ;;  %v3555_v48 = vld [vmem:[#allocation3 + $0x24] sm:$0xf]  ;;  %v2512_v49 = vld [vmem:[#allocation3 + $0x30] sm:$0xf0]  ;;  %v2915_v51 = vor.u32 %v3655_v43, %v2912_v44  ;;  %1094 = vmatmul.bf16.vlgmr.msra.gmra.mxu0 %v4221_v41  ;;  %v3678_v15 = vld [vmem:[#allocation3 + $0x3f4] sm:$0xf0] }
  0x6f   : > { %1167 = vmatpush.bf16.msrb.mxu2 %v2819_v16  ;;  %1107 = vmatmul.bf16.vlgmr.msra.gmra.mxu1 %v4223_v42  ;;  %v3587_v50 = vld [vmem:[#allocation3 + $0x124] sm:$0xf]  ;;  %v2640_v52 = vld [vmem:[#allocation3 + $0x130] sm:$0xf0]  ;;  %v2515_v57 = vor.u32 %v3555_v48, %v2512_v49  ;;  %v2999_v23 = vor.u32 %v3678_v15, %v2998_v14  ;;  %v3610_v24 = vld [vmem:[#allocation3 + $0x1d4] sm:$0xf0] }
  0x70   : > { %1180 = vmatpush.bf16.msrb.mxu3 %v2947_v20  ;;  %v3619_v53 = vld [vmem:[#allocation3 + $0x224] sm:$0xf]  ;;  %v2768_v54 = vld [vmem:[#allocation3 + $0x230] sm:$0xf0]  ;;  %v2643_v60 = vor.u32 %v3587_v50, %v2640_v52  ;;  %v2598_v20 = vld [vmem:[#allocation3 + $0xc8] sm:$0xf]  ;;  %v2727_v30 = vor.u32 %v3610_v24, %v2726_v22 }
  0x71   : > { %1142 = vmatpush.bf16.msrb.mxu0 %v2547_v27  ;;  %v3651_v55 = vld [vmem:[#allocation3 + $0x324] sm:$0xf]  ;;  %v2896_v56 = vld [vmem:[#allocation3 + $0x330] sm:$0xf0]  ;;  %v2771_v61 = vor.u32 %v3619_v53, %v2768_v54  ;;  %v2854_v25 = vld [vmem:[#allocation3 + $0x2c8] sm:$0xf]  ;;  %v2599_v29 = vor.u32 %v3578_v21, %v2598_v20 }
  0x72   : > { %1155 = vmatpush.bf16.msrb.mxu1 %v2675_v28  ;;  %v3551_v58 = vld [vmem:[#allocation3 + $0x4] sm:$0xf]  ;;  %v2496_v59 = vld [vmem:[#allocation3 + $0x10] sm:$0xf0]  ;;  %v2899_v1 = vor.u32 %v3651_v55, %v2896_v56  ;;  %v3642_v26 = vld [vmem:[#allocation3 + $0x2d4] sm:$0xf0] }
  0x73   : > { %1168 = vmatpush.bf16.msrb.mxu2 %v2803_v32  ;;  %v3583_v62 = vld [vmem:[#allocation3 + $0x104] sm:$0xf]  ;;  %v2624_v63 = vld [vmem:[#allocation3 + $0x110] sm:$0xf0]  ;;  %v2499_v8 = vor.u32 %v3551_v58, %v2496_v59  ;;  %v2982_v27 = vld [vmem:[#allocation3 + $0x3c8] sm:$0xf]  ;;  %v2855_v31 = vor.u32 %v3642_v26, %v2854_v25 }
  0x74   : > { %1181 = vmatpush.bf16.msrb.mxu3 %v2931_v37  ;;  %v3615_v0 = vld [vmem:[#allocation3 + $0x204] sm:$0xf]  ;;  %v2752_v2 = vld [vmem:[#allocation3 + $0x210] sm:$0xf0]  ;;  %v2627_v12 = vor.u32 %v3583_v62, %v2624_v63  ;;  %v3674_v28 = vld [vmem:[#allocation3 + $0x3d4] sm:$0xf0] }
  0x75   : > { %1143 = vmatpush.bf16.msrb.mxu0 %v2531_v45  ;;  %v3647_v3 = vld [vmem:[#allocation3 + $0x304] sm:$0xf]  ;;  %v2880_v4 = vld [vmem:[#allocation3 + $0x310] sm:$0xf0]  ;;  %v2755_v13 = vor.u32 %v3615_v0, %v2752_v2  ;;  %v2582_v32 = vld [vmem:[#allocation3 + $0xa8] sm:$0xf]  ;;  %v2983_v37 = vor.u32 %v3674_v28, %v2982_v27 }
  0x76   : > { %1156 = vmatpush.bf16.msrb.mxu1 %v2659_v46  ;;  %v2883_v16 = vor.u32 %v3647_v3, %v2880_v4  ;;  %v3574_v35 = vld [vmem:[#allocation3 + $0xb4] sm:$0xf0]  ;;  %v2710_v36 = vld [vmem:[#allocation3 + $0x1a8] sm:$0xf] }
  0x77   : > { %1169 = vmatpush.bf16.msrb.mxu2 %v2787_v47  ;;  %v3606_v38 = vld [vmem:[#allocation3 + $0x1b4] sm:$0xf0]  ;;  %v2838_v39 = vld [vmem:[#allocation3 + $0x2a8] sm:$0xf]  ;;  %v2583_v45 = vor.u32 %v3574_v35, %v2582_v32 }
  0x78   : > { %1182 = vmatpush.bf16.msrb.mxu3 %v2915_v51  ;;  %v3638_v40 = vld [vmem:[#allocation3 + $0x2b4] sm:$0xf0]  ;;  %v2966_v43 = vld [vmem:[#allocation3 + $0x3a8] sm:$0xf]  ;;  %v2711_v46 = vor.u32 %v3606_v38, %v2710_v36 }
  0x79   : > { %1144 = vmatpush.bf16.msrb.mxu0 %v2515_v57  ;;  %v3670_v44 = vld [vmem:[#allocation3 + $0x3b4] sm:$0xf0]  ;;  %v2839_v47 = vor.u32 %v3638_v40, %v2838_v39  ;;  %v2566_v48 = vld [vmem:[#allocation3 + $0x88] sm:$0xf] }
  0x7a   : > { %1157 = vmatpush.bf16.msrb.mxu1 %v2643_v60  ;;  %v3570_v49 = vld [vmem:[#allocation3 + $0x94] sm:$0xf0]  ;;  %v2694_v50 = vld [vmem:[#allocation3 + $0x188] sm:$0xf]  ;;  %v2967_v51 = vor.u32 %v3670_v44, %v2966_v43 }
  0x7b   : > { %1170 = vmatpush.bf16.msrb.mxu2 %v2771_v61  ;;  %v3602_v52 = vld [vmem:[#allocation3 + $0x194] sm:$0xf0]  ;;  %v2822_v53 = vld [vmem:[#allocation3 + $0x288] sm:$0xf]  ;;  %v2567_v57 = vor.u32 %v3570_v49, %v2566_v48  ;;  %v2744_v49 = vld [vmem:[#allocation3 + $0x1f8] sm:$0xf0] }
  0x7c   : > { %1183 = vmatpush.bf16.msrb.mxu3 %v2899_v1  ;;  %v3634_v54 = vld [vmem:[#allocation3 + $0x294] sm:$0xf0]  ;;  %v2950_v55 = vld [vmem:[#allocation3 + $0x388] sm:$0xf]  ;;  %v2695_v58 = vor.u32 %v3602_v52, %v2694_v50  ;;  %v3644_v50 = vld [vmem:[#allocation3 + $0x2ec] sm:$0xf] }
  0x7d   : > { %1145 = vmatpush.bf16.msrb.mxu0 %v2499_v8  ;;  %v3666_v56 = vld [vmem:[#allocation3 + $0x394] sm:$0xf0]  ;;  %v2823_v59 = vor.u32 %v3634_v54, %v2822_v53  ;;  %v2550_v60 = vld [vmem:[#allocation3 + $0x68] sm:$0xf]  ;;  %v3676_v54 = vld [vmem:[#allocation3 + $0x3ec] sm:$0xf] }
  0x7e   : > { %1158 = vmatpush.bf16.msrb.mxu1 %v2627_v12  ;;  %v3566_v61 = vld [vmem:[#allocation3 + $0x74] sm:$0xf0]  ;;  %v2678_v62 = vld [vmem:[#allocation3 + $0x168] sm:$0xf]  ;;  %v2951_v63 = vor.u32 %v3666_v56, %v2950_v55  ;;  %v3000_v55 = vld [vmem:[#allocation3 + $0x3f8] sm:$0xf0] }
  0x7f   : > { %1171 = vmatpush.bf16.msrb.mxu2 %v2755_v13  ;;  %v3598_v0 = vld [vmem:[#allocation3 + $0x174] sm:$0xf0]  ;;  %v2806_v1 = vld [vmem:[#allocation3 + $0x268] sm:$0xf]  ;;  %v2551_v5 = vor.u32 %v3566_v61, %v2550_v60  ;;  %v3576_v60 = vld [vmem:[#allocation3 + $0xcc] sm:$0xf] }
  0x80   : > { %1184 = vmatpush.bf16.msrb.mxu3 %v2883_v16  ;;  %1146 = vmatmul.bf16.vlgmr.msrb.gmra.mxu0 %v4221_v41  ;;  %v3630_v2 = vld [vmem:[#allocation3 + $0x274] sm:$0xf0]  ;;  %v2934_v3 = vld [vmem:[#allocation3 + $0x368] sm:$0xf]  ;;  %v2679_v6 = vor.u32 %v3598_v0, %v2678_v62  ;;  %v2600_v61 = vld [vmem:[#allocation3 + $0xd8] sm:$0xf0] }
  0x81   : > { %1190 = vmatpush.bf16.msra.mxu0 %v2615_v17  ;;  %1159 = vmatmul.bf16.vlgmr.msrb.gmra.mxu1 %v4223_v42  ;;  %v3662_v4 = vld [vmem:[#allocation3 + $0x374] sm:$0xf0]  ;;  %v2807_v7 = vor.u32 %v3630_v2, %v2806_v1  ;;  %v2534_v8 = vld [vmem:[#allocation3 + $0x48] sm:$0xf]  ;;  %v3608_v62 = vld [vmem:[#allocation3 + $0x1cc] sm:$0xf] }
  0x82   : > { %1203 = vmatpush.bf16.msra.mxu1 %v2743_v18  ;;  %1172 = vmatmul.bf16.vlgmr.msrb.gmra.mxu2 %v4217_v33  ;;  %v3562_v9 = vld [vmem:[#allocation3 + $0x54] sm:$0xf0]  ;;  %v2662_v10 = vld [vmem:[#allocation3 + $0x148] sm:$0xf]  ;;  %v2935_v11 = vor.u32 %v3662_v4, %v2934_v3  ;;  %v2728_v0 = vld [vmem:[#allocation3 + $0x1d8] sm:$0xf0] }
  0x83   : > { %1216 = vmatpush.bf16.msra.mxu2 %v2871_v19  ;;  %1185 = vmatmul.bf16.vlgmr.msrb.gmra.mxu3 %v4219_v34  ;;  %v3594_v12 = vld [vmem:[#allocation3 + $0x154] sm:$0xf0]  ;;  %v2790_v13 = vld [vmem:[#allocation3 + $0x248] sm:$0xf]  ;;  %v2535_v17 = vor.u32 %v3562_v9, %v2534_v8  ;;  %v3640_v1 = vld [vmem:[#allocation3 + $0x2cc] sm:$0xf] }
  0x84   : > { %1229 = vmatpush.bf16.msra.mxu3 %v2999_v23  ;;  %v3626_v14 = vld [vmem:[#allocation3 + $0x254] sm:$0xf0]  ;;  %v2918_v15 = vld [vmem:[#allocation3 + $0x348] sm:$0xf]  ;;  %v2663_v18 = vor.u32 %v3594_v12, %v2662_v10  ;;  %v2856_v2 = vld [vmem:[#allocation3 + $0x2d8] sm:$0xf0] }
  0x85   : > { %1191 = vmatpush.bf16.msra.mxu0 %v2599_v29  ;;  %v3658_v16 = vld [vmem:[#allocation3 + $0x354] sm:$0xf0]  ;;  %v2791_v19 = vor.u32 %v3626_v14, %v2790_v13  ;;  %v2518_v20 = vld [vmem:[#allocation3 + $0x28] sm:$0xf]  ;;  %v3672_v3 = vld [vmem:[#allocation3 + $0x3cc] sm:$0xf] }
  0x86   : > { %1204 = vmatpush.bf16.msra.mxu1 %v2727_v30  ;;  %v3558_v21 = vld [vmem:[#allocation3 + $0x34] sm:$0xf0]  ;;  %v2646_v22 = vld [vmem:[#allocation3 + $0x128] sm:$0xf]  ;;  %v2919_v23 = vor.u32 %v3658_v16, %v2918_v15  ;;  %v2984_v4 = vld [vmem:[#allocation3 + $0x3d8] sm:$0xf0] }
  0x87   : > { %1217 = vmatpush.bf16.msra.mxu2 %v2855_v31  ;;  %v3590_v24 = vld [vmem:[#allocation3 + $0x134] sm:$0xf0]  ;;  %v2774_v25 = vld [vmem:[#allocation3 + $0x228] sm:$0xf]  ;;  %v2519_v29 = vor.u32 %v3558_v21, %v2518_v20  ;;  %v3572_v8 = vld [vmem:[#allocation3 + $0xac] sm:$0xf] }
  0x88   : > { %1230 = vmatpush.bf16.msra.mxu3 %v2983_v37  ;;  %v3622_v26 = vld [vmem:[#allocation3 + $0x234] sm:$0xf0]  ;;  %v2902_v27 = vld [vmem:[#allocation3 + $0x328] sm:$0xf]  ;;  %v2647_v32 = vor.u32 %v3590_v24, %v2646_v22  ;;  %v2584_v9 = vld [vmem:[#allocation3 + $0xb8] sm:$0xf0] }
  0x89   : > { %1192 = vmatpush.bf16.msra.mxu0 %v2583_v45  ;;  %v3654_v28 = vld [vmem:[#allocation3 + $0x334] sm:$0xf0]  ;;  %v2502_v30 = vld [vmem:[#allocation3 + $0x8] sm:$0xf]  ;;  %v2775_v35 = vor.u32 %v3622_v26, %v2774_v25  ;;  %v3580_v45 = vld [vmem:[#allocation3 + $0xec] sm:$0xf] }
  0x8a   : > { %1205 = vmatpush.bf16.msra.mxu1 %v2711_v46  ;;  %v3554_v31 = vld [vmem:[#allocation3 + $0x14] sm:$0xf0]  ;;  %v2630_v36 = vld [vmem:[#allocation3 + $0x108] sm:$0xf]  ;;  %v2903_v39 = vor.u32 %v3654_v28, %v2902_v27  ;;  %v2616_v46 = vld [vmem:[#allocation3 + $0xf8] sm:$0xf0] }
  0x8b   : > { %1218 = vmatpush.bf16.msra.mxu2 %v2839_v47  ;;  %v3586_v37 = vld [vmem:[#allocation3 + $0x114] sm:$0xf0]  ;;  %v2758_v38 = vld [vmem:[#allocation3 + $0x208] sm:$0xf]  ;;  %v3612_v47 = vld [vmem:[#allocation3 + $0x1ec] sm:$0xf]  ;;  %v2503_v48 = vor.u32 %v3554_v31, %v2502_v30 }
  0x8c   : > { %1231 = vmatpush.bf16.msra.mxu3 %v2967_v51  ;;  %v3618_v40 = vld [vmem:[#allocation3 + $0x214] sm:$0xf0]  ;;  %v2886_v43 = vld [vmem:[#allocation3 + $0x308] sm:$0xf]  ;;  %v2872_v51 = vld [vmem:[#allocation3 + $0x2f8] sm:$0xf0]  ;;  %v2631_v52 = vor.u32 %v3586_v37, %v2630_v36 }
  0x8d   : > { %1193 = vmatpush.bf16.msra.mxu0 %v2567_v57  ;;  %v3650_v44 = vld [vmem:[#allocation3 + $0x314] sm:$0xf0]  ;;  %v2759_v53 = vor.u32 %v3618_v40, %v2758_v38  ;;  %v2619_v57 = vor.u32 %v3580_v45, %v2616_v46  ;;  %v3604_v10 = vld [vmem:[#allocation3 + $0x1ac] sm:$0xf]  ;;  %v2712_v12 = vld [vmem:[#allocation3 + $0x1b8] sm:$0xf0] }
  0x8e   : > { %1206 = vmatpush.bf16.msra.mxu1 %v2695_v58  ;;  %v2887_v56 = vor.u32 %v3650_v44, %v2886_v43  ;;  %v2747_v58 = vor.u32 %v3612_v47, %v2744_v49  ;;  %v3636_v13 = vld [vmem:[#allocation3 + $0x2ac] sm:$0xf]  ;;  %v2840_v14 = vld [vmem:[#allocation3 + $0x2b8] sm:$0xf0] }
  0x8f   : > { %1219 = vmatpush.bf16.msra.mxu2 %v2823_v59  ;;  %v2875_v59 = vor.u32 %v3644_v50, %v2872_v51  ;;  %v3668_v15 = vld [vmem:[#allocation3 + $0x3ac] sm:$0xf]  ;;  %v2968_v16 = vld [vmem:[#allocation3 + $0x3b8] sm:$0xf0] }
  0x90   : > { %1232 = vmatpush.bf16.msra.mxu3 %v2951_v63  ;;  %v3003_v63 = vor.u32 %v3676_v54, %v3000_v55  ;;  %v3568_v20 = vld [vmem:[#allocation3 + $0x8c] sm:$0xf]  ;;  %v2568_v21 = vld [vmem:[#allocation3 + $0x98] sm:$0xf0] }
  0x91   : > { %1194 = vmatpush.bf16.msra.mxu0 %v2551_v5  ;;  %v2603_v5 = vor.u32 %v3576_v60, %v2600_v61  ;;  %v3600_v22 = vld [vmem:[#allocation3 + $0x18c] sm:$0xf]  ;;  %v2696_v24 = vld [vmem:[#allocation3 + $0x198] sm:$0xf0] }
  0x92   : > { %1207 = vmatpush.bf16.msra.mxu1 %v2679_v6  ;;  %v2731_v6 = vor.u32 %v3608_v62, %v2728_v0  ;;  %v3632_v25 = vld [vmem:[#allocation3 + $0x28c] sm:$0xf]  ;;  %v2824_v26 = vld [vmem:[#allocation3 + $0x298] sm:$0xf0]  ;;  %v2699_v30 = vor.u32 %v3600_v22, %v2696_v24  ;;  %v3709_v22 = vld [vmem:[#allocation5 + $0xec] sm:$0xf0] }
  0x93   : > { %1220 = vmatpush.bf16.msra.mxu2 %v2807_v7  ;;  %v2859_v7 = vor.u32 %v3640_v1, %v2856_v2  ;;  %v3664_v27 = vld [vmem:[#allocation3 + $0x38c] sm:$0xf]  ;;  %v2952_v28 = vld [vmem:[#allocation3 + $0x398] sm:$0xf0]  ;;  %v2827_v31 = vor.u32 %v3632_v25, %v2824_v26  ;;  %v3120_v25 = vld [vmem:[#allocation5 + $0xf0] sm:$0xf0] }
  0x94   : > { %1233 = vmatpush.bf16.msra.mxu3 %v2935_v11  ;;  %v2987_v11 = vor.u32 %v3672_v3, %v2984_v4  ;;  %v3596_v36 = vld [vmem:[#allocation3 + $0x16c] sm:$0xf]  ;;  %v2955_v37 = vor.u32 %v3664_v27, %v2952_v28  ;;  %v2680_v38 = vld [vmem:[#allocation3 + $0x178] sm:$0xf0]  ;;  %v3102_v27 = vld [vmem:[#allocation5 + $0xc0] sm:$0xf] }
  0x95   : > { %1195 = vmatpush.bf16.msra.mxu0 %v2535_v17  ;;  %v2587_v17 = vor.u32 %v3572_v8, %v2584_v9  ;;  %v2808_v40 = vld [vmem:[#allocation3 + $0x278] sm:$0xf0]  ;;  %v3660_v43 = vld [vmem:[#allocation3 + $0x36c] sm:$0xf]  ;;  %v2683_v46 = vor.u32 %v3596_v36, %v2680_v38  ;;  %v3705_v28 = vld [vmem:[#allocation5 + $0xcc] sm:$0xf0] }
  0x96   : > { %1208 = vmatpush.bf16.msra.mxu1 %v2663_v18  ;;  %v2715_v18 = vor.u32 %v3604_v10, %v2712_v12  ;;  %v2936_v44 = vld [vmem:[#allocation3 + $0x378] sm:$0xf0]  ;;  %v3592_v50 = vld [vmem:[#allocation3 + $0x14c] sm:$0xf]  ;;  %v3697_v38 = vld [vmem:[#allocation5 + $0x8c] sm:$0xf0] }
  0x97   : > { %1221 = vmatpush.bf16.msra.mxu2 %v2791_v19  ;;  %v2843_v19 = vor.u32 %v3636_v13, %v2840_v14  ;;  %v2536_v49 = vld [vmem:[#allocation3 + $0x58] sm:$0xf0]  ;;  %v2939_v51 = vor.u32 %v3660_v43, %v2936_v44  ;;  %v3656_v55 = vld [vmem:[#allocation3 + $0x34c] sm:$0xf] }
  0x98   : > { %1234 = vmatpush.bf16.msra.mxu3 %v2919_v23  ;;  %v2971_v23 = vor.u32 %v3668_v15, %v2968_v16  ;;  %v2792_v54 = vld [vmem:[#allocation3 + $0x258] sm:$0xf0]  ;;  %v3556_v60 = vld [vmem:[#allocation3 + $0x2c] sm:$0xf] }
  0x99   : > { %1196 = vmatpush.bf16.msra.mxu0 %v2519_v29  ;;  %v2571_v29 = vor.u32 %v3568_v20, %v2568_v21  ;;  %v2520_v61 = vld [vmem:[#allocation3 + $0x38] sm:$0xf0]  ;;  %v3588_v62 = vld [vmem:[#allocation3 + $0x12c] sm:$0xf]  ;;  %v3118_v21 = vld [vmem:[#allocation5 + $0xe0] sm:$0xf] }
  0x9a   : > { %1209 = vmatpush.bf16.msra.mxu1 %v2647_v32  ;;  %v3564_v32 = vld [vmem:[#allocation3 + $0x6c] sm:$0xf]  ;;  %v2648_v0 = vld [vmem:[#allocation3 + $0x138] sm:$0xf0]  ;;  %v3119_v24 = vor.u32 %v3709_v22, %v3118_v21 }
  0x9b   : > { %1222 = vmatpush.bf16.msra.mxu2 %v2775_v35  ;;  %v2552_v35 = vld [vmem:[#allocation3 + $0x78] sm:$0xf0]  ;;  %v3620_v1 = vld [vmem:[#allocation3 + $0x22c] sm:$0xf] }
  0x9c   : > { %1235 = vmatpush.bf16.msra.mxu3 %v2903_v39  ;;  %v3628_v39 = vld [vmem:[#allocation3 + $0x26c] sm:$0xf]  ;;  %v2555_v45 = vor.u32 %v3564_v32, %v2552_v35  ;;  %v2776_v2 = vld [vmem:[#allocation3 + $0x238] sm:$0xf0]  ;;  %v3701_v32 = vld [vmem:[#allocation5 + $0xac] sm:$0xf0] }
  0x9d   : > { %1197 = vmatpush.bf16.msra.mxu0 %v2503_v48  ;;  %v2811_v47 = vor.u32 %v3628_v39, %v2808_v40  ;;  %v3560_v48 = vld [vmem:[#allocation3 + $0x4c] sm:$0xf]  ;;  %v2904_v4 = vld [vmem:[#allocation3 + $0x338] sm:$0xf0]  ;;  %v3699_v35 = vld [vmem:[#allocation5 + $0xa4] sm:$0xf] }
  0x9e   : > { %1210 = vmatpush.bf16.msra.mxu1 %v2631_v52  ;;  %v2664_v52 = vld [vmem:[#allocation3 + $0x158] sm:$0xf0]  ;;  %v3652_v3 = vld [vmem:[#allocation3 + $0x32c] sm:$0xf]  ;;  %v3695_v39 = vld [vmem:[#allocation5 + $0x84] sm:$0xf] }
  0x9f   : > { %1223 = vmatpush.bf16.msra.mxu2 %v2759_v53  ;;  %v3624_v53 = vld [vmem:[#allocation3 + $0x24c] sm:$0xf]  ;;  %v2504_v9 = vld [vmem:[#allocation3 + $0x18] sm:$0xf0]  ;;  %v3072_v40 = vld [vmem:[#allocation5 + $0x90] sm:$0xf0] }
  0xa0   : > { %1236 = vmatpush.bf16.msra.mxu3 %v2887_v56  ;;  %1198 = vmatmul.bf16.vlgmr.msra.gmra.mxu0 %v4221_v41  ;;  %v2920_v56 = vld [vmem:[#allocation3 + $0x358] sm:$0xf0]  ;;  %v3552_v8 = vld [vmem:[#allocation3 + $0xc] sm:$0xf]  ;;  %v3075_v44 = vor.u32 %v3695_v39, %v3072_v40  ;;  %v3214_v39 = vld [vmem:[#allocation5 + $0x1a0] sm:$0xf] }
  0xa1   : > { %1242 = vmatpush.bf16.msrb.mxu0 %v2619_v57  ;;  %1211 = vmatmul.bf16.vlgmr.msra.gmra.mxu1 %v4223_v42  ;;  %v2539_v57 = vor.u32 %v3560_v48, %v2536_v49  ;;  %v3584_v10 = vld [vmem:[#allocation3 + $0x10c] sm:$0xf]  ;;  %v2632_v12 = vld [vmem:[#allocation3 + $0x118] sm:$0xf0]  ;;  %v3056_v48 = vld [vmem:[#allocation5 + $0x70] sm:$0xf0] }
  0xa2   : > { %1255 = vmatpush.bf16.msrb.mxu1 %v2747_v58  ;;  %1224 = vmatmul.bf16.vlgmr.msra.gmra.mxu2 %v4217_v33  ;;  %v2667_v58 = vor.u32 %v3592_v50, %v2664_v52  ;;  %v3616_v13 = vld [vmem:[#allocation3 + $0x20c] sm:$0xf]  ;;  %v2760_v14 = vld [vmem:[#allocation3 + $0x218] sm:$0xf0]  ;;  %v3689_v52 = vld [vmem:[#allocation5 + $0x4c] sm:$0xf0] }
  0xa3   : > { %1268 = vmatpush.bf16.msrb.mxu2 %v2875_v59  ;;  %1237 = vmatmul.bf16.vlgmr.msra.gmra.mxu3 %v4219_v34  ;;  %v2795_v59 = vor.u32 %v3624_v53, %v2792_v54  ;;  %v3648_v15 = vld [vmem:[#allocation3 + $0x30c] sm:$0xf]  ;;  %v2888_v16 = vld [vmem:[#allocation3 + $0x318] sm:$0xf0]  ;;  %v3687_v53 = vld [vmem:[#allocation5 + $0x44] sm:$0xf] }
  0xa4   : > { %1281 = vmatpush.bf16.msrb.mxu3 %v3003_v63  ;;  %v2923_v63 = vor.u32 %v3656_v55, %v2920_v56  ;;  %v2891_v20 = vor.u32 %v3648_v15, %v2888_v16  ;;  %v3040_v54 = vld [vmem:[#allocation5 + $0x50] sm:$0xf0]  ;;  %v3733_v40 = vld [vmem:[#allocation5 + $0x1ac] sm:$0xf0] }
  0xa5   : > { %1243 = vmatpush.bf16.msrb.mxu0 %v2603_v5  ;;  %v2523_v5 = vor.u32 %v3556_v60, %v2520_v61  ;;  %v3043_v56 = vor.u32 %v3687_v53, %v3040_v54  ;;  %v3024_v60 = vld [vmem:[#allocation5 + $0x30] sm:$0xf0]  ;;  %v3198_v54 = vld [vmem:[#allocation5 + $0x180] sm:$0xf] }
  0xa6   : > { %1256 = vmatpush.bf16.msrb.mxu1 %v2731_v6  ;;  %v2651_v6 = vor.u32 %v3588_v62, %v2648_v0  ;;  %v3246_v62 = vld [vmem:[#allocation5 + $0x1e0] sm:$0xf] }
  0xa7   : > { %1269 = vmatpush.bf16.msrb.mxu2 %v2859_v7  ;;  %v2779_v7 = vor.u32 %v3620_v1, %v2776_v2  ;;  %v3739_v2 = vld [vmem:[#allocation5 + $0x1e4] sm:$0xf] }
  0xa8   : > { %1282 = vmatpush.bf16.msrb.mxu3 %v2987_v11  ;;  %v2907_v11 = vor.u32 %v3652_v3, %v2904_v4  ;;  %v3248_v3 = vld [vmem:[#allocation5 + $0x1f0] sm:$0xf0] }
  0xa9   : > { %1244 = vmatpush.bf16.msrb.mxu0 %v2587_v17  ;;  %v2507_v17 = vor.u32 %v3552_v8, %v2504_v9  ;;  %v3679_v8 = vld [vmem:[#allocation5 + $0x4] sm:$0xf]  ;;  %v3251_v9 = vor.u32 %v3739_v2, %v3248_v3  ;;  %v3080_v2 = vld [vmem:[#allocation5 + $0x98] sm:$0xf0] }
  0xaa   : > { %1257 = vmatpush.bf16.msrb.mxu1 %v2715_v18  ;;  %v2635_v18 = vor.u32 %v3584_v10, %v2632_v12  ;;  %v3008_v10 = vld [vmem:[#allocation5 + $0x10] sm:$0xf0]  ;;  %v3710_v12 = vld [vmem:[#allocation5 + $0xf4] sm:$0xf0] }
  0xab   : > { %1270 = vmatpush.bf16.msrb.mxu2 %v2843_v19  ;;  %v2763_v19 = vor.u32 %v3616_v13, %v2760_v14  ;;  %v3708_v13 = vld [vmem:[#allocation5 + $0xec] sm:$0xf]  ;;  %v3128_v14 = vld [vmem:[#allocation5 + $0xf8] sm:$0xf0] }
  0xac   : > { %1283 = vmatpush.bf16.msrb.mxu3 %v2971_v23  ;;  %v3707_v23 = vld [vmem:[#allocation5 + $0xe4] sm:$0xf] }
  0xad   : > { %1245 = vmatpush.bf16.msrb.mxu0 %v2571_v29  ;;  %v3123_v26 = vor.u32 %v3707_v23, %v3120_v25  ;;  %v3703_v29 = vld [vmem:[#allocation5 + $0xc4] sm:$0xf] }
  0xae   : > { %1258 = vmatpush.bf16.msrb.mxu1 %v2699_v30  ;;  %v3103_v30 = vor.u32 %v3705_v28, %v3102_v27  ;;  %v3737_v27 = vld [vmem:[#allocation5 + $0x1cc] sm:$0xf0]  ;;  %v3735_v28 = vld [vmem:[#allocation5 + $0x1c4] sm:$0xf] }
  0xaf   : > { %1271 = vmatpush.bf16.msrb.mxu2 %v2827_v31  ;;  %v3104_v31 = vld [vmem:[#allocation5 + $0xd0] sm:$0xf0] }
  0xb0   : > { %1284 = vmatpush.bf16.msrb.mxu3 %v2955_v37  ;;  %v3070_v37 = vld [vmem:[#allocation5 + $0x80] sm:$0xf] }
  0xb1   : > { %1246 = vmatpush.bf16.msrb.mxu0 %v2555_v45  ;;  %v3071_v43 = vor.u32 %v3697_v38, %v3070_v37  ;;  %v3054_v45 = vld [vmem:[#allocation5 + $0x60] sm:$0xf] }
  0xb2   : > { %1259 = vmatpush.bf16.msrb.mxu1 %v2683_v46  ;;  %v3693_v46 = vld [vmem:[#allocation5 + $0x6c] sm:$0xf0] }
  0xb3   : > { %1272 = vmatpush.bf16.msrb.mxu2 %v2811_v47  ;;  %v3691_v47 = vld [vmem:[#allocation5 + $0x64] sm:$0xf]  ;;  %v3055_v49 = vor.u32 %v3693_v46, %v3054_v45  ;;  %v3216_v45 = vld [vmem:[#allocation5 + $0x1b0] sm:$0xf0]  ;;  %v3094_v46 = vld [vmem:[#allocation5 + $0xa8] sm:$0xf] }
  0xb4   : > { %1285 = vmatpush.bf16.msrb.mxu3 %v2939_v51  ;;  %v3059_v50 = vor.u32 %v3691_v47, %v3056_v48  ;;  %v3038_v51 = vld [vmem:[#allocation5 + $0x40] sm:$0xf]  ;;  %v3702_v47 = vld [vmem:[#allocation5 + $0xb4] sm:$0xf0] }
  0xb5   : > { %1247 = vmatpush.bf16.msrb.mxu0 %v2539_v57  ;;  %v3039_v55 = vor.u32 %v3689_v52, %v3038_v51  ;;  %v3022_v57 = vld [vmem:[#allocation5 + $0x20] sm:$0xf]  ;;  %v3700_v51 = vld [vmem:[#allocation5 + $0xac] sm:$0xf]  ;;  %v3096_v52 = vld [vmem:[#allocation5 + $0xb8] sm:$0xf0] }
  0xb6   : > { %1260 = vmatpush.bf16.msrb.mxu1 %v2667_v58  ;;  %v3685_v58 = vld [vmem:[#allocation5 + $0x2c] sm:$0xf0]  ;;  %v3099_v53 = vor.u32 %v3700_v51, %v3096_v52  ;;  %v3711_v51 = vld [vmem:[#allocation5 + $0x104] sm:$0xf] }
  0xb7   : > { %1273 = vmatpush.bf16.msrb.mxu2 %v2795_v59  ;;  %v3683_v59 = vld [vmem:[#allocation5 + $0x24] sm:$0xf]  ;;  %v3023_v0 = vor.u32 %v3685_v58, %v3022_v57 }
  0xb8   : > { %1286 = vmatpush.bf16.msrb.mxu3 %v2923_v63  ;;  %v3741_v63 = vld [vmem:[#allocation5 + $0x1ec] sm:$0xf0] }
  0xb9   : > { %1248 = vmatpush.bf16.msrb.mxu0 %v2523_v5  ;;  %v3247_v1 = vor.u32 %v3741_v63, %v3246_v62  ;;  %v3027_v5 = vor.u32 %v3683_v59, %v3024_v60  ;;  %v3200_v59 = vld [vmem:[#allocation5 + $0x190] sm:$0xf0]  ;;  %v3078_v60 = vld [vmem:[#allocation5 + $0x88] sm:$0xf]  ;;  %v3698_v62 = vld [vmem:[#allocation5 + $0x94] sm:$0xf0] }
  0xba   : > { %1261 = vmatpush.bf16.msrb.mxu1 %v2651_v6  ;;  %v3006_v6 = vld [vmem:[#allocation5] sm:$0xf] }
  0xbb   : > { %1274 = vmatpush.bf16.msrb.mxu2 %v2779_v7  ;;  %v3681_v7 = vld [vmem:[#allocation5 + $0xc] sm:$0xf0] }
  0xbc   : > { %1287 = vmatpush.bf16.msrb.mxu3 %v2907_v11  ;;  %v3126_v11 = vld [vmem:[#allocation5 + $0xe8] sm:$0xf] }
  0xbd   : > { %1249 = vmatpush.bf16.msrb.mxu0 %v2507_v17  ;;  %v3007_v17 = vor.u32 %v3681_v7, %v3006_v6  ;;  %v3182_v7 = vld [vmem:[#allocation5 + $0x160] sm:$0xf] }
  0xbe   : > { %1262 = vmatpush.bf16.msrb.mxu1 %v2635_v18  ;;  %v3011_v18 = vor.u32 %v3679_v8, %v3008_v10  ;;  %v3725_v8 = vld [vmem:[#allocation5 + $0x16c] sm:$0xf0] }
  0xbf   : > { %1275 = vmatpush.bf16.msrb.mxu2 %v2763_v19  ;;  %v3127_v19 = vor.u32 %v3710_v12, %v3126_v11  ;;  %v3183_v10 = vor.u32 %v3725_v8, %v3182_v7  ;;  %v3184_v11 = vld [vmem:[#allocation5 + $0x170] sm:$0xf0]  ;;  %v3062_v12 = vld [vmem:[#allocation5 + $0x68] sm:$0xf] }
  0xc0   : > { %1288 = vmatpush.bf16.msrb.mxu3 %v2891_v20  ;;  %1250 = vmatmul.bf16.vlgmr.msrb.gmra.mxu0 %v4221_v41  ;;  %v3086_v41 = vld [vmem:[#allocation5 + $0xa0] sm:$0xf]  ;;  %v3131_v20 = vor.u32 %v3708_v13, %v3128_v14  ;;  %v3694_v13 = vld [vmem:[#allocation5 + $0x74] sm:$0xf0]  ;;  %v3238_v8 = vld [vmem:[#allocation5 + $0x1c8] sm:$0xf] }
  0xc1   : > { %1263 = vmatmul.bf16.vlgmr.msrb.gmra.mxu1 %v4223_v42  ;;  %1684 = vmatpush.bf16.msra.mxu0 %v3119_v24  ;;  %v3107_v42 = vor.u32 %v3703_v29, %v3104_v31  ;;  %v3232_v31 = vld [vmem:[#allocation5 + $0x1d0] sm:$0xf0] }
  0xc2   : > { %1276 = vmatmul.bf16.vlgmr.msrb.gmra.mxu2 %v4217_v33  ;;  %v3088_v33 = vld [vmem:[#allocation5 + $0xb0] sm:$0xf0]  ;;  %1697 = vmatpush.bf16.msra.mxu1 %v3247_v1  ;;  %v3696_v1 = vld [vmem:[#allocation5 + $0x8c] sm:$0xf] }
  0xc3   : > { %1289 = vmatmul.bf16.vlgmr.msrb.gmra.mxu3 %v4219_v34  ;;  %1710 = vmatpush.bf16.msra.mxu2 %v3123_v26  ;;  %v3087_v34 = vor.u32 %v3701_v32, %v3086_v41  ;;  %v3091_v36 = vor.u32 %v3699_v35, %v3088_v33  ;;  %v3230_v26 = vld [vmem:[#allocation5 + $0x1c0] sm:$0xf]  ;;  %v3110_v41 = vld [vmem:[#allocation5 + $0xc8] sm:$0xf]  ;;  %v3706_v32 = vld [vmem:[#allocation5 + $0xd4] sm:$0xf0] }
  0xc4   : > { %1723 = vmatpush.bf16.msra.mxu3 %v3251_v9  ;;  %v3111_v35 = vor.u32 %v3706_v32, %v3110_v41  ;;  %v3704_v33 = vld [vmem:[#allocation5 + $0xcc] sm:$0xf]  ;;  %v3723_v9 = vld [vmem:[#allocation5 + $0x164] sm:$0xf]  ;;  %v3048_v32 = vld [vmem:[#allocation5 + $0x58] sm:$0xf0] }
  0xc5   : > { %1685 = vmatpush.bf16.msra.mxu0 %v3103_v30  ;;  %v3231_v30 = vor.u32 %v3737_v27, %v3230_v26  ;;  %v3187_v14 = vor.u32 %v3723_v9, %v3184_v11  ;;  %v3738_v9 = vld [vmem:[#allocation5 + $0x1d4] sm:$0xf0] }
  0xc7   : > { %1711 = vmatpush.bf16.msra.mxu2 %v3107_v42  ;;  %v3235_v42 = vor.u32 %v3735_v28, %v3232_v31  ;;  %1698 = vmatpush.bf16.msra.mxu1 %v3231_v30  ;;  %v3046_v28 = vld [vmem:[#allocation5 + $0x48] sm:$0xf]  ;;  %v3690_v30 = vld [vmem:[#allocation5 + $0x54] sm:$0xf0]  ;;  %v3688_v31 = vld [vmem:[#allocation5 + $0x4c] sm:$0xf] }
  0xc8   : > { %v3047_v41 = vor.u32 %v3690_v30, %v3046_v28 }
  0xc9   : > { %1686 = vmatpush.bf16.msra.mxu0 %v3087_v34  ;;  %v3112_v34 = vld [vmem:[#allocation5 + $0xd8] sm:$0xf0]  ;;  %1724 = vmatpush.bf16.msra.mxu3 %v3235_v42  ;;  %v3150_v42 = vld [vmem:[#allocation5 + $0x120] sm:$0xf] }
  0xca   : > { %v3115_v37 = vor.u32 %v3704_v33, %v3112_v34  ;;  %v3051_v33 = vor.u32 %v3688_v31, %v3048_v32  ;;  %v3715_v34 = vld [vmem:[#allocation5 + $0x124] sm:$0xf]  ;;  %v3206_v31 = vld [vmem:[#allocation5 + $0x188] sm:$0xf]  ;;  %v3728_v32 = vld [vmem:[#allocation5 + $0x18c] sm:$0xf] }
  0xcb   : > { %1712 = vmatpush.bf16.msra.mxu2 %v3091_v36 }
  0xcd   : > { %1687 = vmatpush.bf16.msra.mxu0 %v3071_v43  ;;  %v3731_v43 = vld [vmem:[#allocation5 + $0x1a4] sm:$0xf] }
  0xcf   : > { %1713 = vmatpush.bf16.msra.mxu2 %v3075_v44  ;;  %v3215_v44 = vor.u32 %v3733_v40, %v3214_v39  ;;  %v3030_v39 = vld [vmem:[#allocation5 + $0x28] sm:$0xf] }
  0xd1   : > { %1688 = vmatpush.bf16.msra.mxu0 %v3055_v49  ;;  %v3219_v49 = vor.u32 %v3731_v43, %v3216_v45  ;;  %1699 = vmatpush.bf16.msra.mxu1 %v3215_v44  ;;  %v3686_v43 = vld [vmem:[#allocation5 + $0x34] sm:$0xf0]  ;;  %v3684_v44 = vld [vmem:[#allocation5 + $0x2c] sm:$0xf]  ;;  %v3032_v45 = vld [vmem:[#allocation5 + $0x38] sm:$0xf0] }
  0xd3   : > { %1714 = vmatpush.bf16.msra.mxu2 %v3059_v50  ;;  %v3095_v50 = vor.u32 %v3702_v47, %v3094_v46  ;;  %1725 = vmatpush.bf16.msra.mxu3 %v3219_v49  ;;  %v3031_v47 = vor.u32 %v3686_v43, %v3030_v39  ;;  %v3134_v49 = vld [vmem:[#allocation5 + $0x100] sm:$0xf]  ;;  %v3190_v39 = vld [vmem:[#allocation5 + $0x168] sm:$0xf]  ;;  %v3724_v43 = vld [vmem:[#allocation5 + $0x16c] sm:$0xf] }
  0xd5   : > { %1689 = vmatpush.bf16.msra.mxu0 %v3039_v55  ;;  %v3729_v55 = vld [vmem:[#allocation5 + $0x18c] sm:$0xf0] }
  0xd6   : > { %v3199_v58 = vor.u32 %v3729_v55, %v3198_v54  ;;  %v3014_v54 = vld [vmem:[#allocation5 + $0x8] sm:$0xf]  ;;  %v3682_v55 = vld [vmem:[#allocation5 + $0x14] sm:$0xf0] }
  0xd7   : > { %1715 = vmatpush.bf16.msra.mxu2 %v3043_v56  ;;  %v3727_v56 = vld [vmem:[#allocation5 + $0x184] sm:$0xf] }
  0xd8   : > { %v3203_v63 = vor.u32 %v3727_v56, %v3200_v59  ;;  %1700 = vmatpush.bf16.msra.mxu1 %v3199_v58  ;;  %v3680_v58 = vld [vmem:[#allocation5 + $0xc] sm:$0xf]  ;;  %v3016_v59 = vld [vmem:[#allocation5 + $0x18] sm:$0xf0] }
  0xd9   : > { %1690 = vmatpush.bf16.msra.mxu0 %v3023_v0  ;;  %v3079_v0 = vor.u32 %v3698_v62, %v3078_v60  ;;  %v3254_v60 = vld [vmem:[#allocation5 + $0x1e8] sm:$0xf]  ;;  %v3019_v62 = vor.u32 %v3680_v58, %v3016_v59 }
  0xda   : > { %1726 = vmatpush.bf16.msra.mxu3 %v3203_v63  ;;  %v3742_v63 = vld [vmem:[#allocation5 + $0x1f4] sm:$0xf0] }
  0xdb   : > { %1716 = vmatpush.bf16.msra.mxu2 %v3027_v5  ;;  %v3083_v5 = vor.u32 %v3696_v1, %v3080_v2  ;;  %v3256_v1 = vld [vmem:[#allocation5 + $0x1f8] sm:$0xf0] }
  0xdc   : > { %1701 = vmatpush.bf16.msra.mxu1 %v3183_v10  ;;  %v3736_v10 = vld [vmem:[#allocation5 + $0x1cc] sm:$0xf] }
  0xdd   : > { %1691 = vmatpush.bf16.msra.mxu0 %v3007_v17  ;;  %v3063_v17 = vor.u32 %v3694_v13, %v3062_v12  ;;  %v3239_v12 = vor.u32 %v3738_v9, %v3238_v8  ;;  %v3240_v13 = vld [vmem:[#allocation5 + $0x1d8] sm:$0xf0] }
  0xde   : > { %1727 = vmatpush.bf16.msra.mxu3 %v3187_v14  ;;  %v3243_v14 = vor.u32 %v3736_v10, %v3240_v13 }
  0xdf   : > { %1717 = vmatpush.bf16.msra.mxu2 %v3011_v18  ;;  %v3692_v18 = vld [vmem:[#allocation5 + $0x6c] sm:$0xf] }
  0xe1   : > { %1736 = vmatpush.bf16.msrb.mxu0 %v3127_v19  ;;  %v3064_v19 = vld [vmem:[#allocation5 + $0x78] sm:$0xf0] }
  0xe3   : > { %1762 = vmatpush.bf16.msrb.mxu2 %v3131_v20  ;;  %v3166_v20 = vld [vmem:[#allocation5 + $0x140] sm:$0xf] }
  0xe5   : > { %1737 = vmatpush.bf16.msrb.mxu0 %v3111_v35  ;;  %v3717_v35 = vld [vmem:[#allocation5 + $0x12c] sm:$0xf0] }
  0xe6   : > { %v3151_v40 = vor.u32 %v3717_v35, %v3150_v42  ;;  %v3208_v35 = vld [vmem:[#allocation5 + $0x198] sm:$0xf0] }
  0xe7   : > { %1763 = vmatpush.bf16.msrb.mxu2 %v3115_v37  ;;  %v3152_v37 = vld [vmem:[#allocation5 + $0x130] sm:$0xf0] }
  0xe8   : > { %v3155_v46 = vor.u32 %v3715_v34, %v3152_v37 }
  0xe9   : > { %1738 = vmatpush.bf16.msrb.mxu0 %v3095_v50  ;;  %v3713_v50 = vld [vmem:[#allocation5 + $0x10c] sm:$0xf0] }
  0xea   : > { %v3135_v52 = vor.u32 %v3713_v50, %v3134_v49  ;;  %v3722_v49 = vld [vmem:[#allocation5 + $0x154] sm:$0xf0]  ;;  %v3720_v50 = vld [vmem:[#allocation5 + $0x14c] sm:$0xf] }
  0xeb   : > { %v4243_v4 = vpop.f32.mrf.mxu0  ;;  %1764 = vmatpush.bf16.msrb.mxu2 %v3099_v53  ;;  %v3136_v53 = vld [vmem:[#allocation5 + $0x110] sm:$0xf0] }
  0xec   : > { %v4241_v61 = vpop.f32.mrf.mxu1  ;;  %v3139_v56 = vor.u32 %v3711_v51, %v3136_v53  ;;  %v3176_v51 = vld [vmem:[#allocation5 + $0x158] sm:$0xf0] }
  0xed   : > { %1739 = vmatpush.bf16.msrb.mxu0 %v3079_v0  ;;  %v3740_v0 = vld [vmem:[#allocation5 + $0x1ec] sm:$0xf]  ;;  %v1109_v2 = vadd.f32 %v4241_v61, %v4243_v4  ;;  %v3222_v61 = vld [vmem:[#allocation5 + $0x1a8] sm:$0xf]  ;;  %v3734_v4 = vld [vmem:[#allocation5 + $0x1b4] sm:$0xf0]  ;;  %v3179_v53 = vor.u32 %v3720_v50, %v3176_v51 }
  0xee   : > { %v3294_v50 = vld [vmem:[#allocation7 + $0x40] sm:$0xf]  ;;  %v3752_v51 = vld [vmem:[#allocation7 + $0x44] sm:$0xf0] }
  0xef   : > { %v4245_v15 = vpop.f32.mrf.mxu2  ;;  %1765 = vmatpush.bf16.msrb.mxu2 %v3083_v5  ;;  %v3255_v5 = vor.u32 %v3742_v63, %v3254_v60  ;;  %v3142_v60 = vld [vmem:[#allocation5 + $0x108] sm:$0xf]  ;;  %v3712_v63 = vld [vmem:[#allocation5 + $0x10c] sm:$0xf] }
  0xf0   : > { %v4247_v16 = vpop.f32.mrf.mxu3 }
  0xf1   : > { %1740 = vmatpush.bf16.msrb.mxu0 %v3063_v17  ;;  %v1122_v17 = vadd.f32 %v4245_v15, %v1109_v2 }
  0xf3   : > { %v1097_v22 = vpop.f32.mrf.mxu0 }
  0xf4   : > { %v1110_v21 = vpop.f32.mrf.mxu1  ;;  %v3721_v22 = vld [vmem:[#allocation5 + $0x14c] sm:$0xf0] }
  0xf5   : > { %v3067_v21 = vor.u32 %v3692_v18, %v3064_v19  ;;  %v3167_v26 = vor.u32 %v3721_v22, %v3166_v20  ;;  %1741 = vmatpush.bf16.msrb.mxu0 %v3047_v41  ;;  %v3732_v19 = vld [vmem:[#allocation5 + $0x1ac] sm:$0xf]  ;;  %v3223_v22 = vor.u32 %v3734_v4, %v3222_v61  ;;  %v3730_v41 = vld [vmem:[#allocation5 + $0x194] sm:$0xf0] }
  0xf6   : > { %v3207_v42 = vor.u32 %v3730_v41, %v3206_v31  ;;  %v3382_v31 = vld [vmem:[#allocation7 + $0xf0] sm:$0xf]  ;;  %v3774_v41 = vld [vmem:[#allocation7 + $0xf4] sm:$0xf0] }
  0xf7   : > { %v1123_v23 = vpop.f32.mrf.mxu2  ;;  %1766 = vmatpush.bf16.msrb.mxu2 %v3067_v21  ;;  %1702 = vmatpush.bf16.msra.mxu1 %v3167_v26  ;;  %v1135_v26 = vadd.f32 %v4247_v16, %v1122_v17 }
  0xf8   : > { %v1136_v24 = vpop.f32.mrf.mxu3  ;;  %v3719_v23 = vld [vmem:[#allocation5 + $0x144] sm:$0xf] }
  0xf9   : > { %v3168_v24 = vld [vmem:[#allocation5 + $0x150] sm:$0xf0]  ;;  %1742 = vmatpush.bf16.msrb.mxu0 %v3031_v47  ;;  %v3174_v47 = vld [vmem:[#allocation5 + $0x148] sm:$0xf] }
  0xfa   : > { %v3171_v27 = vor.u32 %v3719_v23, %v3168_v24  ;;  %v3224_v23 = vld [vmem:[#allocation5 + $0x1b8] sm:$0xf0] }
  0xfb   : > { %1767 = vmatpush.bf16.msrb.mxu2 %v3051_v33  ;;  %1703 = vmatpush.bf16.msra.mxu1 %v3151_v40  ;;  %v3227_v24 = vor.u32 %v3732_v19, %v3224_v23  ;;  %v3211_v33 = vor.u32 %v3728_v32, %v3208_v35  ;;  %v3726_v40 = vld [vmem:[#allocation5 + $0x174] sm:$0xf0]  ;;  %v3773_v32 = vld [vmem:[#allocation7 + $0xf4] sm:$0xf] }
  0xfc   : > { %1728 = vmatpush.bf16.msra.mxu3 %v3171_v27  ;;  %v3191_v16 = vor.u32 %v3726_v40, %v3190_v39  ;;  %v3304_v40 = vld [vmem:[#allocation7 + $0x58] sm:$0xf0] }
  0xfd   : > { %v4251_v29 = vpop.f32.mrf.mxu0 }
  0xfe   : > { %v4249_v25 = vpop.f32.mrf.mxu1 }
  0xff   : > { %1704 = vmatpush.bf16.msra.mxu1 %v3135_v52  ;;  %v3175_v52 = vor.u32 %v3722_v49, %v3174_v47  ;;  %v3771_v47 = vld [vmem:[#allocation7 + $0xe4] sm:$0xf] }
 0x100   : > { %1729 = vmatpush.bf16.msra.mxu3 %v3155_v46  ;;  %v3192_v46 = vld [vmem:[#allocation5 + $0x178] sm:$0xf0] }
 0x103   : > { %1749 = vmatpush.bf16.msrb.mxu1 %v3255_v5 }
 0x104   : > { %1730 = vmatpush.bf16.msra.mxu3 %v3139_v56  ;;  %v3716_v56 = vld [vmem:[#allocation5 + $0x12c] sm:$0xf] }
 0x105   : > { %v4253_v36 = vpop.f32.mrf.mxu2  ;;  %v1149_v57 = vpop.f32.mrf.mxu0 }
 0x106   : > { %v4255_v38 = vpop.f32.mrf.mxu3  ;;  %v1162_v48 = vpop.f32.mrf.mxu1  ;;  %v3015_v57 = vor.u32 %v3682_v55, %v3014_v54  ;;  %v3158_v54 = vld [vmem:[#allocation5 + $0x128] sm:$0xf]  ;;  %v3718_v55 = vld [vmem:[#allocation5 + $0x134] sm:$0xf0] }
 0x107   : > { %v3035_v48 = vor.u32 %v3684_v44, %v3032_v45  ;;  %1750 = vmatpush.bf16.msrb.mxu1 %v3239_v12  ;;  %v3159_v58 = vor.u32 %v3718_v55, %v3158_v54  ;;  %v3296_v54 = vld [vmem:[#allocation7 + $0x48] sm:$0xf0] }
 0x108   : > { %1743 = vmatpush.bf16.msrb.mxu0 %v3015_v57  ;;  %v3160_v57 = vld [vmem:[#allocation5 + $0x138] sm:$0xf0] }
 0x109   : > { %1768 = vmatpush.bf16.msrb.mxu2 %v3035_v48  ;;  %v3195_v48 = vor.u32 %v3724_v43, %v3192_v46  ;;  %v3163_v59 = vor.u32 %v3716_v56, %v3160_v57  ;;  %v3374_v43 = vld [vmem:[#allocation7 + $0xe0] sm:$0xf]  ;;  %v3366_v56 = vld [vmem:[#allocation7 + $0xd0] sm:$0xf]  ;;  %v3770_v57 = vld [vmem:[#allocation7 + $0xd4] sm:$0xf0] }
 0x10b   : > { %1751 = vmatpush.bf16.msrb.mxu1 %v3223_v22  ;;  %v3320_v22 = vld [vmem:[#allocation7 + $0x78] sm:$0xf0] }
 0x10d   : > { %v1175_v3 = vpop.f32.mrf.mxu2  ;;  %1769 = vmatpush.bf16.msrb.mxu2 %v3019_v62  ;;  %v3714_v62 = vld [vmem:[#allocation5 + $0x114] sm:$0xf0] }
 0x10e   : > { %v1188_v6 = vpop.f32.mrf.mxu3 }
 0x10f   : > { %v3259_v6 = vor.u32 %v3740_v0, %v3256_v1  ;;  %1752 = vmatpush.bf16.msrb.mxu1 %v3207_v42  ;;  %v3144_v0 = vld [vmem:[#allocation5 + $0x118] sm:$0xf0]  ;;  %v3143_v1 = vor.u32 %v3714_v62, %v3142_v60 }
 0x110   : > { %v3147_v2 = vor.u32 %v3712_v63, %v3144_v0  ;;  %v3384_v42 = vld [vmem:[#allocation7 + $0xf8] sm:$0xf0]  ;;  %v3286_v0 = vld [vmem:[#allocation7 + $0x30] sm:$0xf] }
 0x111   : > { %1775 = vmatpush.bf16.msrb.mxu3 %v3259_v6  ;;  %v1161_v6 = vadd.f32 %v4249_v25, %v4251_v29  ;;  %v3318_v29 = vld [vmem:[#allocation7 + $0x70] sm:$0xf]  ;;  %v3387_v35 = vor.u32 %v3773_v32, %v3384_v42  ;;  %v3368_v60 = vld [vmem:[#allocation7 + $0xd8] sm:$0xf0]  ;;  %v3764_v32 = vld [vmem:[#allocation7 + $0xa4] sm:$0xf0] }
 0x113   : > { %1753 = vmatpush.bf16.msrb.mxu1 %v3191_v16  ;;  %v1174_v8 = vadd.f32 %v4253_v36, %v1161_v6  ;;  %v3757_v36 = vld [vmem:[#allocation7 + $0x74] sm:$0xf]  ;;  %v3358_v6 = vld [vmem:[#allocation7 + $0xc0] sm:$0xf] }
 0x114   : > { %v3323_v23 = vor.u32 %v3757_v36, %v3320_v22 }
 0x115   : > { %1776 = vmatpush.bf16.msrb.mxu3 %v3243_v14  ;;  %v1187_v14 = vadd.f32 %v4255_v38, %v1174_v8 }
 0x117   : > { %1754 = vmatpush.bf16.msrb.mxu1 %v3175_v52  ;;  %v3751_v52 = vld [vmem:[#allocation7 + $0x44] sm:$0xf] }
 0x118   : > { %v3299_v55 = vor.u32 %v3751_v52, %v3296_v54  ;;  %v3760_v54 = vld [vmem:[#allocation7 + $0x84] sm:$0xf0] }
 0x119   : > { %1777 = vmatpush.bf16.msrb.mxu3 %v3227_v24  ;;  %v3310_v24 = vld [vmem:[#allocation7 + $0x60] sm:$0xf] }
 0x11b   : > { %1755 = vmatpush.bf16.msrb.mxu1 %v3159_v58  ;;  %v3769_v58 = vld [vmem:[#allocation7 + $0xd4] sm:$0xf] }
 0x11c   : > { %v3371_v63 = vor.u32 %v3769_v58, %v3368_v60 }
 0x11d   : > { %v1199_v3 = vpop.f32.mrf.mxu0  ;;  %1778 = vmatpush.bf16.msrb.mxu3 %v3211_v33  ;;  %v3302_v33 = vld [vmem:[#allocation7 + $0x50] sm:$0xf] }
 0x11e   : > { %v1212_v7 = vpop.f32.mrf.mxu1 }
 0x11f   : > { %v1213_v11 = vadd.f32 %v1212_v7, %v1199_v3  ;;  %1756 = vmatpush.bf16.msrb.mxu1 %v3143_v1  ;;  %v3750_v1 = vld [vmem:[#allocation7 + $0x34] sm:$0xf0] }
 0x121   : > { %1779 = vmatpush.bf16.msrb.mxu3 %v3195_v48  ;;  %v3376_v48 = vld [vmem:[#allocation7 + $0xe8] sm:$0xf0] }
 0x122   : > { %v3379_v49 = vor.u32 %v3771_v47, %v3376_v48  ;;  %v3761_v47 = vld [vmem:[#allocation7 + $0x94] sm:$0xf] }
 0x125   : > { %v1225_v18 = vpop.f32.mrf.mxu2  ;;  %v1201_v28 = vpop.f32.mrf.mxu0  ;;  %1780 = vmatpush.bf16.msrb.mxu3 %v3179_v53  ;;  %v3295_v53 = vor.u32 %v3752_v51, %v3294_v50 }
 0x126   : > { %v1226_v20 = vadd.f32 %v1225_v18, %v1213_v11  ;;  %v1238_v21 = vpop.f32.mrf.mxu3  ;;  %v1214_v30 = vpop.f32.mrf.mxu1  ;;  %v3312_v28 = vld [vmem:[#allocation7 + $0x68] sm:$0xf0] }
 0x128   : > { %v1239_v27 = vadd.f32 %v1238_v21, %v1226_v20  ;;  %v3758_v20 = vld [vmem:[#allocation7 + $0x74] sm:$0xf0] }
 0x129   : > { %1781 = vmatpush.bf16.msrb.mxu3 %v3163_v59  ;;  %v3319_v21 = vor.u32 %v3758_v20, %v3318_v29  ;;  %v3367_v59 = vor.u32 %v3770_v57, %v3366_v56  ;;  %v3766_v29 = vld [vmem:[#allocation7 + $0xb4] sm:$0xf0]  ;;  %v3765_v20 = vld [vmem:[#allocation7 + $0xb4] sm:$0xf]  ;;  %v3328_v57 = vld [vmem:[#allocation7 + $0x88] sm:$0xf0] }
 0x12a   : > { %v1294_v15 = vmax.f32 %v1135_v26, %v1239_v27  ;;  %v3756_v26 = vld [vmem:[#allocation7 + $0x64] sm:$0xf0]  ;;  %v3755_v27 = vld [vmem:[#allocation7 + $0x64] sm:$0xf] }
 0x12b   : > { %v3311_v38 = vor.u32 %v3756_v26, %v3310_v24  ;;  %v3315_v30 = vor.u32 %v3755_v27, %v3312_v28  ;;  %v3270_v24 = vld [vmem:[#allocation7 + $0x10] sm:$0xf]  ;;  %v3746_v26 = vld [vmem:[#allocation7 + $0x14] sm:$0xf0]  ;;  %v3745_v27 = vld [vmem:[#allocation7 + $0x14] sm:$0xf] }
 0x12c   : > { %v1296_v34 = vmax.f32 %v1294_v15, 0.0  ;;  %v3383_v15 = vor.u32 %v3774_v41, %v3382_v31  ;;  %v3272_v28 = vld [vmem:[#allocation7 + $0x18] sm:$0xf0]  ;;  %v3342_v41 = vld [vmem:[#allocation7 + $0xa0] sm:$0xf] }
 0x12d   : > { %v1227_v37 = vpop.f32.mrf.mxu2  ;;  %1782 = vmatpush.bf16.msrb.mxu3 %v3147_v2  ;;  %v3749_v2 = vld [vmem:[#allocation7 + $0x34] sm:$0xf]  ;;  %v3275_v31 = vor.u32 %v3745_v27, %v3272_v28  ;;  %v3343_v42 = vor.u32 %v3764_v32, %v3342_v41 }
 0x12e   : > { %v1298_v44 = vpack.c.bf16 %v1296_v34, %v1296_v34  ;;  %v1240_v45 = vpop.f32.mrf.mxu3  ;;  %v3754_v34 = vld [vmem:[#allocation7 + $0x54] sm:$0xf0]  ;;  %v3753_v37 = vld [vmem:[#allocation7 + $0x54] sm:$0xf] }
 0x12f   : > { %v3303_v39 = vor.u32 %v3754_v34, %v3302_v33  ;;  %v3307_v16 = vor.u32 %v3753_v37, %v3304_v40  ;;  %v3262_v34 = vld [vmem:[#allocation7] sm:$0xf]  ;;  %v3744_v37 = vld [vmem:[#allocation7 + $0x4] sm:$0xf0] }
 0x130   : > { %1692 = vmatmul.bf16.vlgmr.msra.gmra.mxu0 %v1298_v44  ;;  %1718 = vmatmul.bf16.vlgmr.msra.gmra.mxu2 %v1298_v44  ;;  %v3263_v40 = vor.u32 %v3744_v37, %v3262_v34 }
 0x131   : > { %1986 = vmatpush.bf16.msra.mxu0 %v3319_v21  ;;  %2012 = vmatpush.bf16.msra.mxu2 %v3323_v23  ;;  %v3352_v21 = vld [vmem:[#allocation7 + $0xb8] sm:$0xf0] }
 0x132   : > { %v3355_v23 = vor.u32 %v3765_v20, %v3352_v21 }
 0x135   : > { %1987 = vmatpush.bf16.msra.mxu0 %v3311_v38  ;;  %2013 = vmatpush.bf16.msra.mxu2 %v3315_v30  ;;  %v3271_v38 = vor.u32 %v3746_v26, %v3270_v24 }
 0x139   : > { %1988 = vmatpush.bf16.msra.mxu0 %v3303_v39  ;;  %2014 = vmatpush.bf16.msra.mxu2 %v3307_v16  ;;  %v3743_v39 = vld [vmem:[#allocation7 + $0x4] sm:$0xf]  ;;  %v3334_v16 = vld [vmem:[#allocation7 + $0x90] sm:$0xf] }
 0x13d   : > { %v1251_v3 = vpop.f32.mrf.mxu0  ;;  %1989 = vmatpush.bf16.msra.mxu0 %v3295_v53  ;;  %2015 = vmatpush.bf16.msra.mxu2 %v3299_v55  ;;  %v3326_v53 = vld [vmem:[#allocation7 + $0x80] sm:$0xf]  ;;  %v3759_v55 = vld [vmem:[#allocation7 + $0x84] sm:$0xf] }
 0x13e   : > { %v1264_v5 = vpop.f32.mrf.mxu1  ;;  %v3327_v56 = vor.u32 %v3760_v54, %v3326_v53  ;;  %v3331_v58 = vor.u32 %v3759_v55, %v3328_v57 }
 0x13f   : > { %v1265_v7 = vadd.f32 %v1264_v5, %v1251_v3  ;;  %v3287_v3 = vor.u32 %v3750_v1, %v3286_v0  ;;  %v3288_v5 = vld [vmem:[#allocation7 + $0x38] sm:$0xf0] }
 0x140   : > { %1744 = vmatmul.bf16.vlgmr.msrb.gmra.mxu0 %v1298_v44  ;;  %1770 = vmatmul.bf16.vlgmr.msrb.gmra.mxu2 %v1298_v44  ;;  %v3772_v44 = vld [vmem:[#allocation7 + $0xe4] sm:$0xf0] }
 0x141   : > { %v3375_v46 = vor.u32 %v3772_v44, %v3374_v43  ;;  %1990 = vmatpush.bf16.msra.mxu0 %v3287_v3  ;;  %v3264_v43 = vld [vmem:[#allocation7 + $0x8] sm:$0xf0] }
 0x142   : > { %v3267_v44 = vor.u32 %v3743_v39, %v3264_v43 }
 0x145   : > { %v1277_v9 = vpop.f32.mrf.mxu2  ;;  %v1253_v12 = vpop.f32.mrf.mxu0 }
 0x146   : > { %v1278_v10 = vadd.f32 %v1277_v9, %v1265_v7  ;;  %v1290_v11 = vpop.f32.mrf.mxu3  ;;  %v1266_v13 = vpop.f32.mrf.mxu1  ;;  %v3768_v7 = vld [vmem:[#allocation7 + $0xc4] sm:$0xf0]  ;;  %v3291_v9 = vor.u32 %v3749_v2, %v3288_v5  ;;  %v3360_v12 = vld [vmem:[#allocation7 + $0xc8] sm:$0xf0] }
 0x148   : > { %v1291_v17 = vadd.f32 %v1290_v11, %v1278_v10  ;;  %v3359_v10 = vor.u32 %v3768_v7, %v3358_v6  ;;  %v3767_v11 = vld [vmem:[#allocation7 + $0xc4] sm:$0xf]  ;;  %2016 = vmatpush.bf16.msra.mxu2 %v3291_v9 }
 0x149   : > { %v3363_v13 = vor.u32 %v3767_v11, %v3360_v12 }
 0x14a   : > { %v1295_v18 = vmax.f32 %v1187_v14, %v1291_v17  ;;  %v3278_v14 = vld [vmem:[#allocation7 + $0x20] sm:$0xf]  ;;  %v3748_v17 = vld [vmem:[#allocation7 + $0x24] sm:$0xf0] }
 0x14c   : > { %v1297_v61 = vmax.f32 %v1295_v18, 0.0  ;;  %v3747_v18 = vld [vmem:[#allocation7 + $0x24] sm:$0xf] }
 0x14d   : > { %v1279_v4 = vpop.f32.mrf.mxu2 }
 0x14e   : > { %v1299_v19 = vpack.c.bf16 %v1297_v61, %v1297_v61  ;;  %v1292_v25 = vpop.f32.mrf.mxu3  ;;  %v3279_v61 = vor.u32 %v3748_v17, %v3278_v14  ;;  %v3280_v4 = vld [vmem:[#allocation7 + $0x28] sm:$0xf0] }
 0x14f   : > { %v3350_v25 = vld [vmem:[#allocation7 + $0xb0] sm:$0xf] }
 0x150   : > { %1705 = vmatmul.bf16.vlgmr.msra.gmra.mxu1 %v1299_v19  ;;  %1731 = vmatmul.bf16.vlgmr.msra.gmra.mxu3 %v1299_v19  ;;  %v3351_v36 = vor.u32 %v3766_v29, %v3350_v25 }
 0x151   : > { %1999 = vmatpush.bf16.msra.mxu1 %v3383_v15  ;;  %2025 = vmatpush.bf16.msra.mxu3 %v3387_v35  ;;  %v3763_v15 = vld [vmem:[#allocation7 + $0xa4] sm:$0xf]  ;;  %v3344_v35 = vld [vmem:[#allocation7 + $0xa8] sm:$0xf0] }
 0x152   : > { %1991 = vmatpush.bf16.msra.mxu0 %v3279_v61  ;;  %v3347_v33 = vor.u32 %v3763_v15, %v3344_v35 }
 0x155   : > { %2000 = vmatpush.bf16.msra.mxu1 %v3375_v46  ;;  %2026 = vmatpush.bf16.msra.mxu3 %v3379_v49  ;;  %v3762_v46 = vld [vmem:[#allocation7 + $0x94] sm:$0xf0]  ;;  %v3336_v49 = vld [vmem:[#allocation7 + $0x98] sm:$0xf0] }
 0x156   : > { %1992 = vmatpush.bf16.msra.mxu0 %v3271_v38  ;;  %v3335_v48 = vor.u32 %v3762_v46, %v3334_v16  ;;  %v3339_v51 = vor.u32 %v3761_v47, %v3336_v49 }
 0x159   : > { %2001 = vmatpush.bf16.msra.mxu1 %v3367_v59  ;;  %2027 = vmatpush.bf16.msra.mxu3 %v3371_v63 }
 0x15a   : > { %1993 = vmatpush.bf16.msra.mxu0 %v3263_v40 }
 0x15d   : > { %2002 = vmatpush.bf16.msra.mxu1 %v3359_v10  ;;  %2028 = vmatpush.bf16.msra.mxu3 %v3363_v13 }
 0x160   : > { %1757 = vmatmul.bf16.vlgmr.msrb.gmra.mxu1 %v1299_v19  ;;  %1783 = vmatmul.bf16.vlgmr.msrb.gmra.mxu3 %v1299_v19  ;;  %v3283_v19 = vor.u32 %v3747_v18, %v3280_v4 }
 0x161   : > { %2003 = vmatpush.bf16.msra.mxu1 %v3351_v36  ;;  %2029 = vmatpush.bf16.msra.mxu3 %v3355_v23 }
 0x162   : > { %2017 = vmatpush.bf16.msra.mxu2 %v3283_v19 }
 0x165   : > { %2004 = vmatpush.bf16.msra.mxu1 %v3343_v42  ;;  %2030 = vmatpush.bf16.msra.mxu3 %v3347_v33 }
 0x166   : > { %2018 = vmatpush.bf16.msra.mxu2 %v3275_v31 }
 0x169   : > { %2005 = vmatpush.bf16.msra.mxu1 %v3335_v48  ;;  %2031 = vmatpush.bf16.msra.mxu3 %v3339_v51 }
 0x16a   : > { %2019 = vmatpush.bf16.msra.mxu2 %v3267_v44 }
 0x16d   : > { %2006 = vmatpush.bf16.msra.mxu1 %v3327_v56  ;;  %2032 = vmatpush.bf16.msra.mxu3 %v3331_v58 }
 0x1ad   : > { %v4265_v45 = vpop.f32.mrf.mxu0 }
 0x1b3   : > { %v4267_v62 = vpop.f32.mrf.mxu2 }
 0x1b5   : > { %v1695_v8 = vpop.f32.mrf.mxu0 }
 0x1bb   : > { %v1721_v22 = vpop.f32.mrf.mxu2 }
 0x1bd   : > { %v1745_v30 = vpop.f32.mrf.mxu0 }
 0x1c3   : > { %v1771_v50 = vpop.f32.mrf.mxu2 }
 0x1c5   : > { %v1747_v52 = vpop.f32.mrf.mxu0 }
 0x1cb   : > { %v1773_v60 = vpop.f32.mrf.mxu2 }
 0x1cd   : > { %v1706_v59 = vpop.f32.mrf.mxu1 }
 0x1ce   : > { %v1707_v3 = vadd.f32 %v1706_v59, %v4265_v45 }
 0x1d3   : > { %v1732_v63 = vpop.f32.mrf.mxu3 }
 0x1d4   : > { %v1733_v9 = vadd.f32 %v1732_v63, %v4267_v62 }
 0x1d5   : > { %v1708_v0 = vpop.f32.mrf.mxu1 }
 0x1db   : > { %v1734_v1 = vpop.f32.mrf.mxu3 }
 0x1dd   : > { %v1758_v2 = vpop.f32.mrf.mxu1 }
 0x1de   : > { %v1759_v5 = vadd.f32 %v1758_v2, %v1745_v30 }
 0x1e0   : > { %v1788_v6 = vmax.f32 %v1707_v3, %v1759_v5 }
 0x1e2   : > { %v1790_v7 = vmax.f32 %v1788_v6, 0.0 }
 0x1e3   : > { %v1784_v8 = vpop.f32.mrf.mxu3 }
 0x1e4   : > { %v1792_v10 = vpack.c.bf16 %v1790_v7, %v1790_v7  ;;  %v1785_v11 = vadd.f32 %v1784_v8, %v1771_v50 }
 0x1e5   : > { %v1760_v12 = vpop.f32.mrf.mxu1 }
 0x1e6   : > { %v1789_v13 = vmax.f32 %v1733_v9, %v1785_v11  ;;  %1994 = vmatmul.bf16.vlgmr.msra.gmra.mxu0 %v1792_v10  ;;  %2020 = vmatmul.bf16.vlgmr.msra.gmra.mxu2 %v1792_v10 }
 0x1e8   : > { %v1791_v14 = vmax.f32 %v1789_v13, 0.0 }
 0x1ea   : > { %v1793_v17 = vpack.c.bf16 %v1791_v14, %v1791_v14 }
 0x1eb   : > { %v1786_v18 = vpop.f32.mrf.mxu3 }
 0x1ec   : > { %2007 = vmatmul.bf16.vlgmr.msra.gmra.mxu1 %v1793_v17  ;;  %2033 = vmatmul.bf16.vlgmr.msra.gmra.mxu3 %v1793_v17 }
 0x263   : > { %v1995_v61 = vpop.f32.mrf.mxu0 }
 0x269   : > { %v2008_v4 = vpop.f32.mrf.mxu1  ;;  %v2021_v45 = vpop.f32.mrf.mxu2 }
 0x26a   : > { %v2009_v29 = vadd.f32 %v2008_v4, %v1995_v61 }
 0x26b   : > { %v1997_v19 = vpop.f32.mrf.mxu0 }
 0x26f   : > { %v2034_v25 = vpop.f32.mrf.mxu3 }
 0x270   : > { %v2035_v20 = vadd.f32 %v2034_v25, %v2021_v45 }
 0x271   : > { %v2010_v36 = vpop.f32.mrf.mxu1  ;;  %v2023_v62 = vpop.f32.mrf.mxu2 }
 0x272   : > { %v2038_v21 = vmax.f32 %v2009_v29, %v2035_v20 }
 0x274   : > { %v2039_v22 = vmax.f32 %v2038_v21, 0.0 }
 0x276   : > { %v2040_v23 = vpack.c.bf16 %v2039_v22, %v2039_v22 }
 0x277   : > { %v2036_v24 = vpop.f32.mrf.mxu3 }
 0x278   : > { %2041 = vst [vmem:[#allocation2] sm:$0x1] %v2040_v23 }
 0x279 PF: > { %v3530_v26 = vld [vmem:[%s4200_s11 + $0x118] sm:$0xf]  ;;  %v3812_v27 = vld [vmem:[%s4200_s11 + $0x128] sm:$0xf0]  ;;  %v3510_v38 = vld [vmem:[%s4200_s11 + $0xf0] sm:$0xf] }
 0x27a   : > { %v3531_v28 = vor.u32 %v3812_v27, %v3530_v26  ;;  %v3807_v30 = vld [vmem:[%s4200_s11 + $0x100] sm:$0xf0]  ;;  %v3538_v31 = vld [vmem:[%s4200_s11 + $0x120] sm:$0xf]  ;;  %v3813_v41 = vld [vmem:[%s4200_s11 + $0x130] sm:$0xf0] }
 0x27b   : > { %v3539_v32 = vor.u32 %v3813_v41, %v3538_v31  ;;  %v3811_v15 = vld [vmem:[%s4200_s11 + $0x124] sm:$0xf]  ;;  %v3540_v42 = vld [vmem:[%s4200_s11 + $0x134] sm:$0xf0]  ;;  %v3490_v35 = vld [vmem:[%s4200_s11 + $0xc8] sm:$0xf]  ;;  %v3511_v33 = vor.u32 %v3807_v30, %v3510_v38 }
 0x27c   : > { %2299 = vmatpush.bf16.msra.mxu0 %v3531_v28  ;;  %v3543_v34 = vor.u32 %v3811_v15, %v3540_v42  ;;  %v3802_v37 = vld [vmem:[%s4200_s11 + $0xd8] sm:$0xf0]  ;;  %v3518_v39 = vld [vmem:[%s4200_s11 + $0xf8] sm:$0xf]  ;;  %v3808_v40 = vld [vmem:[%s4200_s11 + $0x108] sm:$0xf0] }
 0x27d   : > { %2325 = vmatpush.bf16.msra.mxu2 %v3539_v32  ;;  %v3519_v43 = vor.u32 %v3808_v40, %v3518_v39  ;;  %v3806_v44 = vld [vmem:[%s4200_s11 + $0xfc] sm:$0xf]  ;;  %v3520_v16 = vld [vmem:[%s4200_s11 + $0x10c] sm:$0xf0]  ;;  %v3803_v51 = vld [vmem:[%s4200_s11 + $0xe0] sm:$0xf0]  ;;  %v3491_v53 = vor.u32 %v3802_v37, %v3490_v35 }
 0x27e   : > { %v3810_v46 = vld [vmem:[%s4200_s11 + $0x11c] sm:$0xf]  ;;  %2338 = vmatpush.bf16.msra.mxu3 %v3543_v34  ;;  %v3523_v47 = vor.u32 %v3806_v44, %v3520_v16  ;;  %v3532_v48 = vld [vmem:[%s4200_s11 + $0x12c] sm:$0xf0]  ;;  %v3801_v52 = vld [vmem:[%s4200_s11 + $0xd4] sm:$0xf] }
 0x27f   : > { %v3535_v49 = vor.u32 %v3810_v46, %v3532_v48  ;;  %v3498_v50 = vld [vmem:[%s4200_s11 + $0xd0] sm:$0xf]  ;;  %v3500_v54 = vld [vmem:[%s4200_s11 + $0xe4] sm:$0xf0]  ;;  %v3805_v55 = vld [vmem:[%s4200_s11 + $0xf4] sm:$0xf] }
 0x280   : > { %2300 = vmatpush.bf16.msra.mxu0 %v3511_v33  ;;  %v3512_v56 = vld [vmem:[%s4200_s11 + $0x104] sm:$0xf0]  ;;  %v3470_v57 = vld [vmem:[%s4200_s11 + $0xa0] sm:$0xf]  ;;  %v3797_v58 = vld [vmem:[%s4200_s11 + $0xb0] sm:$0xf0]  ;;  %v3499_v59 = vor.u32 %v3803_v51, %v3498_v50  ;;  %v3503_v63 = vor.u32 %v3801_v52, %v3500_v54 }
 0x281   : > { %2326 = vmatpush.bf16.msra.mxu2 %v3519_v43  ;;  %2312 = vmatpush.bf16.msra.mxu1 %v3535_v49  ;;  %v3515_v60 = vor.u32 %v3805_v55, %v3512_v56  ;;  %v3478_v0 = vld [vmem:[%s4200_s11 + $0xa8] sm:$0xf]  ;;  %v3798_v1 = vld [vmem:[%s4200_s11 + $0xb8] sm:$0xf0]  ;;  %v3796_v2 = vld [vmem:[%s4200_s11 + $0xac] sm:$0xf]  ;;  %v3471_v7 = vor.u32 %v3797_v58, %v3470_v57 }
 0x282   : > { %2339 = vmatpush.bf16.msra.mxu3 %v3523_v47  ;;  %v3480_v3 = vld [vmem:[%s4200_s11 + $0xbc] sm:$0xf0]  ;;  %v3800_v5 = vld [vmem:[%s4200_s11 + $0xcc] sm:$0xf]  ;;  %v3450_v8 = vld [vmem:[%s4200_s11 + $0x78] sm:$0xf]  ;;  %v3479_v10 = vor.u32 %v3798_v1, %v3478_v0 }
 0x283   : > { %v3492_v6 = vld [vmem:[%s4200_s11 + $0xdc] sm:$0xf0]  ;;  %v3792_v9 = vld [vmem:[%s4200_s11 + $0x88] sm:$0xf0]  ;;  %v3483_v13 = vor.u32 %v3796_v2, %v3480_v3  ;;  %v3793_v14 = vld [vmem:[%s4200_s11 + $0x90] sm:$0xf0] }
 0x284   : > { %2301 = vmatpush.bf16.msra.mxu0 %v3491_v53  ;;  %v3495_v11 = vor.u32 %v3800_v5, %v3492_v6  ;;  %v3458_v12 = vld [vmem:[%s4200_s11 + $0x80] sm:$0xf]  ;;  %v3795_v17 = vld [vmem:[%s4200_s11 + $0xa4] sm:$0xf]  ;;  %v3472_v18 = vld [vmem:[%s4200_s11 + $0xb4] sm:$0xf0]  ;;  %v3451_v45 = vor.u32 %v3792_v9, %v3450_v8 }
 0x285   : > { %2327 = vmatpush.bf16.msra.mxu2 %v3499_v59  ;;  %2313 = vmatpush.bf16.msra.mxu1 %v3515_v60  ;;  %v3791_v61 = vld [vmem:[%s4200_s11 + $0x84] sm:$0xf]  ;;  %v3460_v4 = vld [vmem:[%s4200_s11 + $0x94] sm:$0xf0]  ;;  %v3430_v19 = vld [vmem:[%s4200_s11 + $0x50] sm:$0xf]  ;;  %v3459_v29 = vor.u32 %v3793_v14, %v3458_v12  ;;  %v3475_v20 = vor.u32 %v3795_v17, %v3472_v18 }
 0x286   : > { %2340 = vmatpush.bf16.msra.mxu3 %v3503_v63  ;;  %v3787_v25 = vld [vmem:[%s4200_s11 + $0x60] sm:$0xf0]  ;;  %v3438_v36 = vld [vmem:[%s4200_s11 + $0x58] sm:$0xf]  ;;  %v3463_v62 = vor.u32 %v3791_v61, %v3460_v4  ;;  %v3788_v21 = vld [vmem:[%s4200_s11 + $0x68] sm:$0xf0] }
 0x287   : > { %v3790_v22 = vld [vmem:[%s4200_s11 + $0x7c] sm:$0xf]  ;;  %v3452_v23 = vld [vmem:[%s4200_s11 + $0x8c] sm:$0xf0]  ;;  %v3431_v27 = vor.u32 %v3787_v25, %v3430_v19  ;;  %v3410_v38 = vld [vmem:[%s4200_s11 + $0x28] sm:$0xf]  ;;  %v3439_v30 = vor.u32 %v3788_v21, %v3438_v36 }
 0x288   : > { %2302 = vmatpush.bf16.msra.mxu0 %v3471_v7  ;;  %v3786_v24 = vld [vmem:[%s4200_s11 + $0x5c] sm:$0xf]  ;;  %v3440_v26 = vld [vmem:[%s4200_s11 + $0x6c] sm:$0xf0]  ;;  %v3455_v31 = vor.u32 %v3790_v22, %v3452_v23  ;;  %v3783_v15 = vld [vmem:[%s4200_s11 + $0x40] sm:$0xf0] }
 0x289   : > { %2328 = vmatpush.bf16.msra.mxu2 %v3479_v10  ;;  %2314 = vmatpush.bf16.msra.mxu1 %v3495_v11  ;;  %v3782_v28 = vld [vmem:[%s4200_s11 + $0x38] sm:$0xf0]  ;;  %v3418_v41 = vld [vmem:[%s4200_s11 + $0x30] sm:$0xf]  ;;  %v3443_v32 = vor.u32 %v3786_v24, %v3440_v26  ;;  %v3785_v42 = vld [vmem:[%s4200_s11 + $0x54] sm:$0xf] }
 0x28a   : > { %2341 = vmatpush.bf16.msra.mxu3 %v3483_v13  ;;  %v3432_v35 = vld [vmem:[%s4200_s11 + $0x64] sm:$0xf0]  ;;  %v3781_v33 = vld [vmem:[%s4200_s11 + $0x34] sm:$0xf]  ;;  %v3411_v37 = vor.u32 %v3782_v28, %v3410_v38  ;;  %v3390_v39 = vld [vmem:[%s4200_s11] sm:$0xf]  ;;  %v3419_v43 = vor.u32 %v3783_v15, %v3418_v41 }
 0x28b   : > { %v3420_v34 = vld [vmem:[%s4200_s11 + $0x44] sm:$0xf0]  ;;  %v3777_v40 = vld [vmem:[%s4200_s11 + $0x10] sm:$0xf0]  ;;  %v3814_v16 = vld [vmem:[%s4200_s11 + $0x138] sm:$0xf0]  ;;  %v3435_v46 = vor.u32 %v3785_v42, %v3432_v35 }
 0x28c   : > { %2303 = vmatpush.bf16.msra.mxu0 %v3451_v45  ;;  %v3546_v44 = vld [vmem:[%s4200_s11 + $0x128] sm:$0xf]  ;;  %v3423_v47 = vor.u32 %v3781_v33, %v3420_v34  ;;  %v3778_v49 = vld [vmem:[%s4200_s11 + $0x18] sm:$0xf0]  ;;  %v3776_v50 = vld [vmem:[%s4200_s11 + $0xc] sm:$0xf]  ;;  %v3391_v54 = vor.u32 %v3777_v40, %v3390_v39 }
 0x28d   : > { %2329 = vmatpush.bf16.msra.mxu2 %v3459_v29  ;;  %2315 = vmatpush.bf16.msra.mxu1 %v3475_v20  ;;  %v3398_v48 = vld [vmem:[%s4200_s11 + $0x8] sm:$0xf]  ;;  %v3400_v51 = vld [vmem:[%s4200_s11 + $0x1c] sm:$0xf0]  ;;  %v3780_v52 = vld [vmem:[%s4200_s11 + $0x2c] sm:$0xf]  ;;  %v3547_v55 = vor.u32 %v3814_v16, %v3546_v44 }
 0x28e   : > { %2342 = vmatpush.bf16.msra.mxu3 %v3463_v62  ;;  %v3412_v53 = vld [vmem:[%s4200_s11 + $0x3c] sm:$0xf0]  ;;  %v3399_v56 = vor.u32 %v3778_v49, %v3398_v48  ;;  %v3403_v57 = vor.u32 %v3776_v50, %v3400_v51  ;;  %v3809_v59 = vld [vmem:[%s4200_s11 + $0x110] sm:$0xf0]  ;;  %v3775_v63 = vld [vmem:[%s4200_s11 + $0x4] sm:$0xf] }
 0x28f   : > { %v3526_v58 = vld [vmem:[%s4200_s11 + $0x100] sm:$0xf]  ;;  %v3415_v60 = vor.u32 %v3780_v52, %v3412_v53  ;;  %v3392_v0 = vld [vmem:[%s4200_s11 + $0x14] sm:$0xf0]  ;;  %v2042_v1 = vld [vmem:[#allocation2] sm:$0x1] }
 0x290   : > { %2304 = vmatpush.bf16.msra.mxu0 %v3431_v27  ;;  %v3527_v2 = vor.u32 %v3809_v59, %v3526_v58  ;;  %v3506_v3 = vld [vmem:[%s4200_s11 + $0xd8] sm:$0xf]  ;;  %v3804_v5 = vld [vmem:[%s4200_s11 + $0xe8] sm:$0xf0]  ;;  %v3395_v6 = vor.u32 %v3775_v63, %v3392_v0  ;;  %v3486_v8 = vld [vmem:[%s4200_s11 + $0xb0] sm:$0xf] }
 0x291   : > { %2330 = vmatpush.bf16.msra.mxu2 %v3439_v30  ;;  %2316 = vmatpush.bf16.msra.mxu1 %v3455_v31  ;;  %v3507_v7 = vor.u32 %v3804_v5, %v3506_v3  ;;  %v3799_v9 = vld [vmem:[%s4200_s11 + $0xc0] sm:$0xf0]  ;;  %v3466_v11 = vld [vmem:[%s4200_s11 + $0x88] sm:$0xf]  ;;  %v3794_v12 = vld [vmem:[%s4200_s11 + $0x98] sm:$0xf0] }
 0x292   : > { %2343 = vmatpush.bf16.msra.mxu3 %v3443_v32  ;;  %v3487_v10 = vor.u32 %v3799_v9, %v3486_v8  ;;  %v3467_v13 = vor.u32 %v3794_v12, %v3466_v11  ;;  %v3446_v14 = vld [vmem:[%s4200_s11 + $0x60] sm:$0xf]  ;;  %v3789_v17 = vld [vmem:[%s4200_s11 + $0x70] sm:$0xf0]  ;;  %v3426_v61 = vld [vmem:[%s4200_s11 + $0x38] sm:$0xf] }
 0x293   : > { %v3447_v18 = vor.u32 %v3789_v17, %v3446_v14  ;;  %v3784_v4 = vld [vmem:[%s4200_s11 + $0x48] sm:$0xf0]  ;;  %v3406_v19 = vld [vmem:[%s4200_s11 + $0x10] sm:$0xf]  ;;  %v3779_v25 = vld [vmem:[%s4200_s11 + $0x20] sm:$0xf0] }
 0x294   : > { %2305 = vmatpush.bf16.msra.mxu0 %v3411_v37  ;;  %v3427_v45 = vor.u32 %v3784_v4, %v3426_v61  ;;  %v3407_v29 = vor.u32 %v3779_v25, %v3406_v19  ;;  %vm2371_vm0 = vcmask 1041408   ;;  %vm2373_vm1 = vcmask 1045508  }
 0x295   : > { %2331 = vmatpush.bf16.msra.mxu2 %v3419_v43  ;;  %2317 = vmatpush.bf16.msra.mxu1 %v3435_v46  ;;  %vm2375_vm2 = vcmask 1043456  }
 0x296   : > { %2344 = vmatpush.bf16.msra.mxu3 %v3423_v47 }
 0x298   : > { %2306 = vmatpush.bf16.msra.mxu0 %v3391_v54 }
 0x299   : > { %2332 = vmatpush.bf16.msra.mxu2 %v3399_v56  ;;  %2318 = vmatpush.bf16.msra.mxu1 %v3415_v60 }
 0x29a   : > { %2345 = vmatpush.bf16.msra.mxu3 %v3403_v57 }
 0x29b   : > { %2307 = vmatmul.bf16.vlgmr.msra.gmra.mxu0 %v2042_v1 }
 0x29c   : > { %2351 = vmatpush.bf16.msrb.mxu0 %v3547_v55  ;;  %2333 = vmatmul.bf16.vlgmr.msra.gmra.mxu2 %v2042_v1 }
 0x29d   : > { %2346 = vmatmul.bf16.vlgmr.msra.gmra.mxu3 %v2042_v1  ;;  %2319 = vmatpush.bf16.msra.mxu1 %v3395_v6 }
 0x2a0   : > { %2352 = vmatpush.bf16.msrb.mxu0 %v3527_v2  ;;  %2320 = vmatmul.bf16.vlgmr.msra.gmra.mxu1 %v2042_v1 }
 0x2a4   : > { %2353 = vmatpush.bf16.msrb.mxu0 %v3507_v7 }
 0x2a8   : > { %2354 = vmatpush.bf16.msrb.mxu0 %v3487_v10 }
 0x2ac   : > { %2355 = vmatpush.bf16.msrb.mxu0 %v3467_v13 }
 0x2b0   : > { %2356 = vmatpush.bf16.msrb.mxu0 %v3447_v18 }
 0x2b4   : > { %2357 = vmatpush.bf16.msrb.mxu0 %v3427_v45 }
 0x2b8   : > { %2358 = vmatpush.bf16.msrb.mxu0 %v3407_v29 }
 0x2bb   : > { %2359 = vmatmul.bf16.vlgmr.msrb.gmra.mxu0 %v2042_v1 }
 0x318   : > { %v2308_v20 = vpop.f32.mrf.mxu0 }
 0x31d   : > { %v2321_v36 = vpop.f32.mrf.mxu1 }
 0x31e   : > { %v2368_v62 = vrot.slane %v2321_v36, 6 }
 0x31f   : > { %v2334_v21 = vpop.f32.mrf.mxu2 }
 0x320   : > { %v2369_v22 = vrot.slane %v2334_v21, 4  ;;  %v2347_v23 = vpop.f32.mrf.mxu3  ;;  %v2310_v24 = vpop.f32.mrf.mxu0  ;;  %v2372_v26 = vsel %vm2371_vm0, %v2308_v20, %v2368_v62 }
 0x321   : > { %v2370_v27 = vrot.slane %v2347_v23, 2 }
 0x323   : > { %v2374_v38 = vsel %vm2373_vm1, %v2369_v22, %v2370_v27 }
 0x324   : > { %v2376_v28 = vsel %vm2375_vm2, %v2372_v26, %v2374_v38 }
 0x325   : > { %2378 = vst [vmem:[%s4210_s15] sm:$0xff] %v2376_v28  ;;  %v2323_v30 = vpop.f32.mrf.mxu1 }
 0x327   : > { %v2336_v31 = vpop.f32.mrf.mxu2 }
 0x328   : > { %v2349_v41 = vpop.f32.mrf.mxu3 }
 0x338   : > { %v2360_v32 = vpop.f32.mrf.mxu0 }
 0x339   : > { %2379 = vst [vmem:[%s4210_s15 + $0x8] sm:$0x3] %v2360_v32 }
 0x340   : > { %v2362_v15 = vpop.f32.mrf.mxu0 }
 0x341 PF: > { %p17_p1 = scmp.ge.s32.totalorder %s4158_s26, 11   ;;  %s4376_s18 = smov %s4048_s19 }
 0x342   : > { %s4377_s19 = smov %s4052_s20  ;;  %s4378_s20 = smov %s4168_s29 }
 0x343   : > { %s4379_s21 = smov %s4158_s26  ;;  %19 = sbr.rel (!%p17_p1) target bundleno = 5 (0x5), region = 97 }
 0x348   :  { %2402 = vsyncpa [#allocation4], 1 }
 0x349   :  { %2404 = vsyncpa [#allocation4 + $0x1], 1 }
 0x34a   :  { %2405 = vsyncpa [#allocation6], 1 }
 0x34b   :  { %2406 = vsyncpa [#allocation9], 1 }
 0x34c   :  { %2408 = vsyncpa [#allocation9 + $0x1], 1 }

</bundles_post_ra>
